<compile_context>
chip_gen: v7x
topology: tpu7x:2x2x1
jax: 0.10.0
libtpu: 0.0.40
codegen_flags: <defaults>
</compile_context>

<pallas_src>
import functools

import jax
import jax.numpy as jnp
from jax.experimental import pallas as pl
from jax.experimental.pallas import tpu as pltpu


_ACTIVATIONS = {
    "silu": lambda x: x * jax.lax.logistic(x),
    "tanh": jnp.tanh,
    "relu": lambda x: jnp.maximum(x, jnp.zeros_like(x)),
    "sin": jnp.sin,
}

# Contract the last dim of both operands (A @ B^T) — same pattern as the TPU
# flash-attention reference kernel; avoids materializing a transpose of the
# (tile_m, d_in) activation tile.
_TRANS_B_DIMS = (((1,), (1,)), ((), ()))


def _device_kind() -> str:
    try:
        return jax.devices()[0].device_kind.lower()
    except Exception:  # pragma: no cover - defensive
        return ""


def _default_tile_m(kind: str) -> int:
    # v5e: single vector-store slot + 16 MiB scoped-VMEM default -> keep 512.
    if ("v5e" in kind) or ("v5 lite" in kind) or ("v5lite" in kind):
        return 512
    # v6e / v7x (and unknown/newer): bigger tiles amortize per-step overhead.
    return 1024


def _default_bf16_act(kind: str, use_bf16: bool) -> bool:
    # bf16 VPU/EUP datapaths exist on v6e / v7x; elsewhere keep f32 activations.
    return use_bf16 and (("v6" in kind) or ("v7" in kind) or ("tpu7" in kind))


def _make_mlp_kernel(act_fn, n_hidden, mxu_dtype, act_dtype):
    """refs = (x, w0, b0, ..., w_{n_hidden-1}, b_{n_hidden-1}, w_out, b_out, o)."""

    def kernel(*refs):
        x_ref, o_ref = refs[0], refs[-1]
        wb = refs[1:-1]

        # (tile_m, d_in) block of the raw descriptor; the cast to the MXU dtype
        # happens here (one f32 HBM read) instead of an extra wrapper-side
        # convert pass (f32 read + bf16 write + bf16 read).
        x = x_ref[...].astype(mxu_dtype)

        # Layer 0: (H1, d_in) x (tile_m, d_in)^T -> (H1, tile_m).  Keeps the
        # big atom tile on the 128-wide lane dim for every activation.
        h = jax.lax.dot_general(
            wb[0][...], x, dimension_numbers=_TRANS_B_DIMS,
            preferred_element_type=jnp.float32)
        h = act_fn(h.astype(act_dtype) + wb[1][...])

        for li in range(1, n_hidden):
            w_ref, b_ref = wb[2 * li], wb[2 * li + 1]
            h = jnp.dot(w_ref[...], h.astype(mxu_dtype),
                        preferred_element_type=jnp.float32)
            h = act_fn(h.astype(act_dtype) + b_ref[...])

        # Final out_features == 1 layer: VPU multiply + sublane (XLU) reduce in
        # f32 emits the lane-dense (1, tile_m) row directly; scalar bias SMEM.
        w_out_ref, b_out_ref = wb[-2], wb[-1]
        out = jnp.sum(h.astype(jnp.float32) * w_out_ref[...],
                      axis=0, keepdims=True) + b_out_ref[0]
        o_ref[...] = out.astype(o_ref.dtype)

    return kernel


@functools.partial(
    jax.jit,
    static_argnames=("activation_type", "tile_m", "use_bf16", "bf16_activations"))
def atomic_subnetwork_forward(descriptor, params, *, activation_type="silu",
                              tile_m=None, use_bf16=True, bf16_activations=None):
    """Pallas forward for AtomicSubNetwork.

    descriptor: (N, input_size) float32.
    params: ((w, b), ...) in PyTorch nn.Linear layout
            (w: (out_features, in_features), b: (out_features,));
            the last pair maps the final hidden width to 1.
    Returns (N, 1) atomic energies (same semantics as the PyTorch module).
    """
    assert len(params) >= 2, "expect at least one hidden layer plus the output layer"
    act_fn = _ACTIVATIONS[activation_type]
    n_hidden = len(params) - 1
    N, d_in = descriptor.shape

    kind = _device_kind()
    if tile_m is None:
        tile_m = _default_tile_m(kind)
    tile_m = max(128, (tile_m // 128) * 128)          # keep lane-dense tiles
    if bf16_activations is None:
        bf16_activations = _default_bf16_act(kind, use_bf16)

    mxu_dtype = jnp.bfloat16 if use_bf16 else descriptor.dtype
    act_dtype = jnp.bfloat16 if bf16_activations else jnp.float32

    # Ragged tail handled by Pallas edge-block masking (out-of-bounds input
    # lanes read garbage that never crosses lanes; out-of-bounds output lanes
    # are dropped on store) — no pad pass.
    grid = (pl.cdiv(N, tile_m),)

    def const_spec(shape):
        return pl.BlockSpec(shape, lambda i: (0,) * len(shape))

    # Descriptor streams straight from HBM as (tile_m, d_in) blocks.
    operands = [descriptor]
    in_specs = [pl.BlockSpec((tile_m, d_in), lambda i: (i, 0))]
    for w, b in params[:-1]:
        h_out = w.shape[0]
        operands += [w.astype(mxu_dtype), b.reshape(h_out, 1).astype(act_dtype)]
        in_specs += [const_spec(tuple(w.shape)), const_spec((h_out, 1))]
    w_out, b_out = params[-1]
    h_last = w_out.shape[1]
    operands += [w_out.reshape(h_last, 1).astype(jnp.float32),
                 b_out.reshape(1).astype(jnp.float32)]
    in_specs += [const_spec((h_last, 1)),
                 pl.BlockSpec(memory_space=pltpu.MemorySpace.SMEM)]

    # Advisory cost so XLA schedules surrounding ops around the custom call.
    widths = [d_in] + [w.shape[0] for w, _ in params]
    flops = 2 * N * sum(a * b for a, b in zip(widths[:-1], widths[1:]))
    transcendentals = (N * sum(w.shape[0] for w, _ in params[:-1])
                       if activation_type in ("silu", "tanh", "sin") else 0)
    param_bytes = sum(w.size * (2 if use_bf16 else 4) + b.size * 4 for w, b in params)
    bytes_accessed = N * d_in * descriptor.dtype.itemsize + N * 4 + param_bytes

    out = pl.pallas_call(
        _make_mlp_kernel(act_fn, n_hidden, mxu_dtype, act_dtype),
        out_shape=jax.ShapeDtypeStruct((1, N), descriptor.dtype),
        grid_spec=pltpu.PrefetchScalarGridSpec(
            num_scalar_prefetch=0,
            grid=grid,
            in_specs=in_specs,
            # Lane-dense output: one (1, tile_m) row per grid step; only the
            # ragged last block's out-of-bounds lanes are masked on store.
            out_specs=pl.BlockSpec((1, tile_m), lambda i: (0, i)),
        ),
        compiler_params=pltpu.CompilerParams(
            # Independent atom tiles: megacore-shard the grid on v7x.
            dimension_semantics=("parallel",),
        ),
        cost_estimate=pl.CostEstimate(
            flops=int(flops),
            transcendentals=int(transcendentals),
            bytes_accessed=int(bytes_accessed)),
    )(*operands)

    return out.reshape(N, 1)


def init_params(key, input_size, hidden_layer_size):
    """nn.Linear-style init (uniform +-1/sqrt(fan_in)), PyTorch (out, in) layout."""
    sizes = [input_size] + list(hidden_layer_size) + [1]
    params = []
    for fan_in, fan_out in zip(sizes[:-1], sizes[1:]):
        key, kw, kb = jax.random.split(key, 3)
        bound = 1.0 / (fan_in ** 0.5)
        w = jax.random.uniform(kw, (fan_out, fan_in), jnp.float32, -bound, bound)
        b = jax.random.uniform(kb, (fan_out,), jnp.float32, -bound, bound)
        params.append((w, b))
    return tuple(params)


def reference_forward(descriptor, params, activation_type="silu"):
    act = {"silu": jax.nn.silu, "tanh": jnp.tanh,
           "relu": jax.nn.relu, "sin": jnp.sin}[activation_type]
    h = descriptor
    for w, b in params[:-1]:
        h = act(h @ w.T + b)
    w, b = params[-1]
    return h @ w.T + b


if __name__ == "__main__":
    key = jax.random.PRNGKey(0)
    k_x, k_p = jax.random.split(key)

    # Small shapes consistent with the module: 2048 atoms, 32-dim descriptor,
    # hidden layers [64, 64], scalar atomic-energy output.  With the default
    # tile_m (512 on v5e, 1024 elsewhere) this gives >= 2 evenly divisible
    # grid steps, keeping both v7x TensorCores busy.
    num_atoms, input_size = 2048, 32
    hidden_layer_size = [64, 64]

    descriptor = jax.random.normal(k_x, (num_atoms, input_size), jnp.float32)
    params = init_params(k_p, input_size, hidden_layer_size)
    ref = reference_forward(descriptor, params)

    # 1) Default path: bf16 MXU operands + f32 accumulation (bf16 bias/act on
    #    v6e/v7x) — agrees with the f32 reference at the ~1e-2 level.
    energy = atomic_subnetwork_forward(descriptor, params)
    energy = jax.block_until_ready(energy)
    assert energy.shape == (num_atoms, 1)
    assert jnp.allclose(energy, ref, atol=5e-2, rtol=5e-2)

    # 2) Ragged atom count (not a tile multiple): exercises Pallas masked edge
    #    blocks — no wrapper-side padding pass.
    n_ragged = 2000
    energy_ragged = atomic_subnetwork_forward(descriptor[:n_ragged], params)
    energy_ragged = jax.block_until_ready(energy_ragged)
    assert energy_ragged.shape == (n_ragged, 1)
    assert jnp.allclose(energy_ragged, ref[:n_ragged], atol=5e-2, rtol=5e-2)

    # 3) f32-operand path (use_bf16=False, f32 activations): closely matches
    #    the f32 reference (default TPU dot precision, f32 accumulation).
    energy_f32 = atomic_subnetwork_forward(descriptor, params,
                                           use_bf16=False, bf16_activations=False)
    energy_f32 = jax.block_until_ready(energy_f32)
    assert jnp.allclose(energy_f32, ref, atol=1e-4, rtol=1e-4)

    print("KERNEL_OK")
</pallas_src>

<mosaic_0001>
module attributes {stable_mosaic.version = 11 : i64} {
  func.func @kernel(%arg0: i32, %arg1: memref<1024x32xf32, #tpu.memory_space<vmem>>, %arg2: memref<64x32xbf16, #tpu.memory_space<vmem>>, %arg3: memref<64x1xf32, #tpu.memory_space<vmem>>, %arg4: memref<64x64xbf16, #tpu.memory_space<vmem>>, %arg5: memref<64x1xf32, #tpu.memory_space<vmem>>, %arg6: memref<64x1xf32, #tpu.memory_space<vmem>>, %arg7: memref<1xf32, #tpu.memory_space<smem>>, %arg8: memref<1x1024xf32, #tpu.memory_space<vmem>>) attributes {dimension_semantics = [#tpu.dimension_semantics<parallel>], iteration_bounds = array<i64: 2>, scalar_prefetch = 0 : i64, scratch_operands = 0 : i64, tpu.core_type = #tpu.core_type<tc>, window_params = [{transform_indices = @transform_0, window_bounds = array<i64: 1024, 32>}, {pipeline_mode = #tpu.pipeline_mode<synchronous>, transform_indices = @transform_1, window_bounds = array<i64: 64, 32>}, {pipeline_mode = #tpu.pipeline_mode<synchronous>, transform_indices = @transform_2, window_bounds = array<i64: 64, 1>}, {pipeline_mode = #tpu.pipeline_mode<synchronous>, transform_indices = @transform_3, window_bounds = array<i64: 64, 64>}, {pipeline_mode = #tpu.pipeline_mode<synchronous>, transform_indices = @transform_4, window_bounds = array<i64: 64, 1>}, {pipeline_mode = #tpu.pipeline_mode<synchronous>, transform_indices = @transform_5, window_bounds = array<i64: 64, 1>}, {transform_indices = @transform_6, window_bounds = array<i64: 1>}, {transform_indices = @transform_7, window_bounds = array<i64: 1, 1024>}]} {
    %c0 = arith.constant 0 : index
    %c0_0 = arith.constant 0 : index
    %0 = vector.load %arg1[%c0, %c0_0] : memref<1024x32xf32, #tpu.memory_space<vmem>>, vector<1024x32xf32>
    %1 = arith.truncf %0 : vector<1024x32xf32> to vector<1024x32xbf16>
    %c0_1 = arith.constant 0 : index
    %c0_2 = arith.constant 0 : index
    %2 = vector.load %arg2[%c0_1, %c0_2] : memref<64x32xbf16, #tpu.memory_space<vmem>>, vector<64x32xbf16>
    %cst = arith.constant dense<0.000000e+00> : vector<64x1024xf32>
    %3 = tpu.matmul %2, %1, %cst {dimension_numbers = #tpu.dot_dimension_numbers<[1], [1], [0], [0], [0, 0, 1, 0], [], []>} : vector<64x32xbf16>, vector<1024x32xbf16>, vector<64x1024xf32> -> vector<64x1024xf32>
    %c0_3 = arith.constant 0 : index
    %c0_4 = arith.constant 0 : index
    %4 = vector.load %arg3[%c0_3, %c0_4] : memref<64x1xf32, #tpu.memory_space<vmem>>, vector<64x1xf32>
    %5 = vector.broadcast %4 : vector<64x1xf32> to vector<64x1024xf32>
    %6 = arith.addf %3, %5 : vector<64x1024xf32>
    %7 = arith.negf %6 : vector<64x1024xf32>
    %8 = math.exp %7 : vector<64x1024xf32>
    %cst_5 = arith.constant 1.000000e+00 : f32
    %9 = vector.broadcast %cst_5 : f32 to vector<64x1024xf32>
    %10 = arith.addf %9, %8 : vector<64x1024xf32>
    %11 = arith.divf %9, %10 : vector<64x1024xf32>
    %12 = arith.mulf %6, %11 : vector<64x1024xf32>
    %c0_6 = arith.constant 0 : index
    %c0_7 = arith.constant 0 : index
    %13 = vector.load %arg4[%c0_6, %c0_7] : memref<64x64xbf16, #tpu.memory_space<vmem>>, vector<64x64xbf16>
    %14 = arith.truncf %12 : vector<64x1024xf32> to vector<64x1024xbf16>
    %cst_8 = arith.constant dense<0.000000e+00> : vector<64x1024xf32>
    %15 = tpu.matmul %13, %14, %cst_8 {dimension_numbers = #tpu.dot_dimension_numbers<[1], [0], [0], [1], [0, 0, 1, 1], [], []>} : vector<64x64xbf16>, vector<64x1024xbf16>, vector<64x1024xf32> -> vector<64x1024xf32>
    %c0_9 = arith.constant 0 : index
    %c0_10 = arith.constant 0 : index
    %16 = vector.load %arg5[%c0_9, %c0_10] : memref<64x1xf32, #tpu.memory_space<vmem>>, vector<64x1xf32>
    %17 = vector.broadcast %16 : vector<64x1xf32> to vector<64x1024xf32>
    %18 = arith.addf %15, %17 : vector<64x1024xf32>
    %19 = arith.negf %18 : vector<64x1024xf32>
    %20 = math.exp %19 : vector<64x1024xf32>
    %cst_11 = arith.constant 1.000000e+00 : f32
    %21 = vector.broadcast %cst_11 : f32 to vector<64x1024xf32>
    %22 = arith.addf %21, %20 : vector<64x1024xf32>
    %23 = arith.divf %21, %22 : vector<64x1024xf32>
    %24 = arith.mulf %18, %23 : vector<64x1024xf32>
    %c0_12 = arith.constant 0 : index
    %c0_13 = arith.constant 0 : index
    %25 = vector.load %arg6[%c0_12, %c0_13] : memref<64x1xf32, #tpu.memory_space<vmem>>, vector<64x1xf32>
    %26 = vector.broadcast %25 : vector<64x1xf32> to vector<64x1024xf32>
    %27 = arith.mulf %24, %26 : vector<64x1024xf32>
    %cst_14 = arith.constant dense<0.000000e+00> : vector<1024xf32>
    %28 = vector.multi_reduction <add>, %27, %cst_14 [0] : vector<64x1024xf32> to vector<1024xf32>
    %29 = vector.shape_cast %28 : vector<1024xf32> to vector<1x1024xf32>
    %c0_15 = arith.constant 0 : index
    %30 = memref.load %arg7[%c0_15] : memref<1xf32, #tpu.memory_space<smem>>
    %31 = vector.broadcast %30 : f32 to vector<1x1024xf32>
    %32 = arith.addf %29, %31 : vector<1x1024xf32>
    %c0_16 = arith.constant 0 : index
    %c0_17 = arith.constant 0 : index
    %33 = vector.load %arg8[%c0_16, %c0_17] : memref<1x1024xf32, #tpu.memory_space<vmem>>, vector<1x1024xf32>
    tpu.vector_store %arg8[%c0_16, %c0_17], %32 {strides = array<i32>} : memref<1x1024xf32, #tpu.memory_space<vmem>>, vector<1x1024xf32>,
    return
  }
  func.func @transform_0(%arg0: i32) -> (i32, i32) {
    %c0_i32 = arith.constant 0 : i32
    %c0_i32_0 = arith.constant 0 : i32
    return %arg0, %c0_i32 : i32, i32
  }
  func.func @transform_1(%arg0: i32) -> (i32, i32) {
    %c0_i32 = arith.constant 0 : i32
    %c0_i32_0 = arith.constant 0 : i32
    %c0_i32_1 = arith.constant 0 : i32
    return %c0_i32, %c0_i32_0 : i32, i32
  }
  func.func @transform_2(%arg0: i32) -> (i32, i32) {
    %c0_i32 = arith.constant 0 : i32
    %c0_i32_0 = arith.constant 0 : i32
    %c0_i32_1 = arith.constant 0 : i32
    return %c0_i32, %c0_i32_0 : i32, i32
  }
  func.func @transform_3(%arg0: i32) -> (i32, i32) {
    %c0_i32 = arith.constant 0 : i32
    %c0_i32_0 = arith.constant 0 : i32
    %c0_i32_1 = arith.constant 0 : i32
    return %c0_i32, %c0_i32_0 : i32, i32
  }
  func.func @transform_4(%arg0: i32) -> (i32, i32) {
    %c0_i32 = arith.constant 0 : i32
    %c0_i32_0 = arith.constant 0 : i32
    %c0_i32_1 = arith.constant 0 : i32
    return %c0_i32, %c0_i32_0 : i32, i32
  }
  func.func @transform_5(%arg0: i32) -> (i32, i32) {
    %c0_i32 = arith.constant 0 : i32
    %c0_i32_0 = arith.constant 0 : i32
    %c0_i32_1 = arith.constant 0 : i32
    return %c0_i32, %c0_i32_0 : i32, i32
  }
  func.func @transform_6(%arg0: i32) -> i32 {
    %c0_i32 = arith.constant 0 : i32
    %c0_i32_0 = arith.constant 0 : i32
    return %c0_i32 : i32
  }
  func.func @transform_7(%arg0: i32) -> (i32, i32) {
    %c0_i32 = arith.constant 0 : i32
    %c0_i32_0 = arith.constant 0 : i32
    return %c0_i32, %arg0 : i32, i32
  }
}

</mosaic_0001>

<bundles_post_ra>
// kernel: atomic_subnetwork_forward.1
= control target key start
LH: loop header
LB: loop body
LE: loop exit
PB: predicated region body
PF: predicated region fallthrough
CT: control target
= control target key end

     0   :  { %s5233_s0 = inlined_call_operand.vmem [shape: f32[2048,32], index: 0, kind: input, shape index: {}]   ;;  %s5234_s1 = inlined_call_operand.vmem [shape: bf16[64,32], index: 1, kind: input, shape index: {}]   ;;  %s5235_s2 = inlined_call_operand.vmem [shape: f32[64,1], index: 2, kind: input, shape index: {}]   ;;  %s5236_s3 = inlined_call_operand.vmem [shape: bf16[64,64], index: 3, kind: input, shape index: {}]   ;;  %s5237_s4 = inlined_call_operand.vmem [shape: f32[64,1], index: 4, kind: input, shape index: {}]   ;;  %s5238_s5 = inlined_call_operand.vmem [shape: f32[64,1], index: 5, kind: input, shape index: {}]   ;;  %s5239_s6 = inlined_call_operand.<no memory space> [shape: f32[1], index: 6, kind: input, shape index: {}]   ;;  %s5240_s7 = inlined_call_operand.hbm [shape: f32[1,2048], index: 7, kind: output, shape index: {}]  }
   0x1   :  { %12 = sst [smem:[#allocation2]] %s5239_s6 }
   0x2   :  { %13 = vsyncpa [#allocation4], 0 }
   0x3   :  { %15 = vsyncpa [#allocation4 + $0x1], 0  ;;  %s3697_s26 = smov 0   ;;  %s3699_s27 = smov 0  }
   0x4   :  { %s3701_s28 = smov 0   ;;  %s3703_s29 = smov 0  }
   0x5 LB: > { %s2714_s6 = sadd.s32 4294967295, %s3649_s29   ;;  %s2715_s30 = sadd.s32 4294967294, %s3649_s29   ;;  %s3649_s29 = sphi %s3703_s29, %s5262_s29   ;;  %s3645_s28 = sphi %s3701_s28, %s5261_s28   ;;  %s3641_s27 = sphi %s3699_s27, %s5260_s27   ;;  %s3637_s26 = sphi %s3697_s26, %s5259_s26  }
   0x6   : > { %s3720_s8 = sadd.s32 1, %s3649_s29   ;;  %s180_s9 = sadd.s32 1, %s3645_s28 }
   0x7   : > { %s177_s10 = ssub.s32 %s3649_s29, %s3720_s8  ;;  %p190_p0 = scmp.ne.s32.totalorder %s3645_s28, %s3641_s27 }
   0x8   : > { %p178_p1 = scmp.eq.s32.totalorder %s177_s10, 0  ;;  %p191_p2 = scmp.eq.s32.totalorder %s2714_s6, 1 }
   0x9   : > { %p196_p3 = scmp.ne.s32.totalorder %s3641_s27, %s3637_s26  ;;  %p197_p4 = scmp.eq.s32.totalorder %s2715_s30, 1 }
   0xa   : > { %s3730_s11 = scalar_select %p178_p1, %s3645_s28, %s180_s9  }
   0xb   : > { %p3732_p5 = por %p191_p2, %p190_p0  ;;  %p3736_p6 = por %p197_p4, %p196_p3 }
   0xc   : > { %p2718_p7 = scmp.ge.s32.totalorder %s3649_s29, 1  ;;  %p242_p8 = scmp.lt.s32.totalorder %s3649_s29, 3 }
   0xe   : > { %p243_p9 = pnand %p2718_p7, %p242_p8 }
  0x10   : > { %246 = sbr.rel (%p243_p9) target bundleno = 829 (0x33d), region = 48 }
  0x17   : > { %s3742_s14 = sshll.u32 %s2714_s6, 7  ;;  %v3748_v0 = vld [vmem:[%s5234_s1] sm:$0xff]   ;;  %vm550_vm0 = vcmask 261120   ;;  %v3651_v29 = vmov 0   ;;  %vm1603_vm1 = vcmask 523264   ;;  %s4946_s30 = sld [smem:[#allocation2]] }
  0x18   : > { %p275_p10 = scmp.lt.s32.totalorder %s3742_s14, 255  ;;  %2912 = vmatprep.mubr.msk.bf16.mxu0 %vm550_vm0, %v3748_v0  ;;  %2936 = vmatprep.mubr.msk.bf16.mxu1 %vm550_vm0, %v3748_v0  ;;  %s271_s9 = sand.u32 1, %s3641_s27  }
  0x19   : > { %3065 = vset.pattern.permute.xlu0 %v3651_v29  ;;  %3066 = vset.pattern.permute.xlu1 %v3651_v29  ;;  %s2719_s10 = sshll.u32 %s271_s9, 3  ;;  %s2642_s19 = scalar_lea.sflag [#allocation4], %s271_s9 }
  0x1a   : > { %s276_s17 = scalar_select %p275_p10, %s3742_s14, 255 }
  0x1b   : > { %s273_s15 = scalar_lea.vmem [#allocation3], %s2719_s10  ;;  %s3653_s22 = smov [#allocation3]  }
  0x1c   : > { %s2721_s18 = sshll.u32 %s276_s17, 3  ;;  %s2656_s16 = sshll.u32 %s273_s15, 4  ;;  %s5193_s16 = int_to_ptr.vmem [resolvable:$true] %s2656_s16 }
  0x1d   : > { %s3758_s21 = scalar_lea.vmem %s5233_s0, %s2721_s18  ;;  %s3587_s20 = scalar_lea.vmem %s5193_s16, 128 }
  0x1e   : > { %v298_v1 = vld [vmem:[%s3758_s21 + $0x80] sm:$0xff]  ;;  %v299_v2 = vld [vmem:[%s3758_s21 + $0x88] sm:$0xff]  ;;  %v300_v12 = vld [vmem:[%s3758_s21 + $0x90] sm:$0xff]  ;;  %p3588_p11 = scmp.ne.s32.totalorder %s5193_s16, %s3587_s20  ;;  %s3591_s23 = sshll.u32 %s3653_s22, 4  ;;  %s3592_s23 = int_to_ptr.vmem [resolvable:$false] %s3591_s23 }
  0x1f   : > { %v330_v3 = vld [vmem:[%s3758_s21 + $0x180] sm:$0xff]  ;;  %v418_v4 = vpack.c.bf16 %v299_v2, %v298_v1  ;;  %v331_v5 = vld [vmem:[%s3758_s21 + $0x188] sm:$0xff]  ;;  %v301_v14 = vld [vmem:[%s3758_s21 + $0x98] sm:$0xff]  ;;  %s3593_s24 = scalar_lea.vmem %s3592_s23, 256  ;;  %p3594_p0 = scmp.lt.s32.totalorder %s5193_s16, %s3592_s23 }
  0x20   : > { %v282_v6 = vld [vmem:[%s3758_s21] sm:$0xff]  ;;  %v283_v7 = vld [vmem:[%s3758_s21 + $0x8] sm:$0xff]  ;;  %v434_v8 = vpack.c.bf16 %v331_v5, %v330_v3  ;;  %v332_v15 = vld [vmem:[%s3758_s21 + $0x190] sm:$0xff]  ;;  %v419_v18 = vpack.c.bf16 %v301_v14, %v300_v12  ;;  %p3589_p12 = pnand %p3588_p11, %p3732_p5  ;;  %p3595_p1 = scmp.lt.s32.totalorder %s3593_s24, %s3587_s20 }
  0x21   : > { %v410_v9 = vpack.c.bf16 %v283_v7, %v282_v6  ;;  %v314_v10 = vld [vmem:[%s3758_s21 + $0x100] sm:$0xff]  ;;  %v315_v11 = vld [vmem:[%s3758_s21 + $0x108] sm:$0xff]  ;;  %2992 = vmatprep.subr.msk.bf16.mxu0 %vm550_vm0, %v418_v4  ;;  %v333_v16 = vld [vmem:[%s3758_s21 + $0x198] sm:$0xff] }
  0x22   : > { %v426_v13 = vpack.c.bf16 %v315_v11, %v314_v10  ;;  %3000 = vmatprep.subr.msk.bf16.mxu1 %vm550_vm0, %v434_v8  ;;  %v435_v19 = vpack.c.bf16 %v333_v16, %v332_v15  ;;  %v284_v20 = vld [vmem:[%s3758_s21 + $0x10] sm:$0xff]  ;;  %v285_v21 = vld [vmem:[%s3758_s21 + $0x18] sm:$0xff]  ;;  %v302_v27 = vld [vmem:[%s3758_s21 + $0xa0] sm:$0xff]  ;;  %p3590_p13 = pneg %p3589_p12  ;;  %p3596_p2 = por %p3595_p1, %p3594_p0 }
  0x23   : > { %v564_v17 = vsel %vm550_vm0, %v410_v9, 0  ;;  %v316_v22 = vld [vmem:[%s3758_s21 + $0x110] sm:$0xff]  ;;  %v317_v24 = vld [vmem:[%s3758_s21 + $0x118] sm:$0xff]  ;;  %v411_v25 = vpack.c.bf16 %v285_v21, %v284_v20  ;;  %v303_v28 = vld [vmem:[%s3758_s21 + $0xa8] sm:$0xff] }
  0x24   : > { %2897 = vmatpush3.bf16.xpose.msra.mxu0 %v564_v17  ;;  %v612_v23 = vsel %vm550_vm0, %v426_v13, 0  ;;  %v427_v26 = vpack.c.bf16 %v317_v24, %v316_v22  ;;  %v334_v30 = vld [vmem:[%s3758_s21 + $0x1a0] sm:$0xff]  ;;  %v335_v31 = vld [vmem:[%s3758_s21 + $0x1a8] sm:$0xff]  ;;  %v420_v33 = vpack.c.bf16 %v303_v28, %v302_v27  ;;  %v304_v42 = vld [vmem:[%s3758_s21 + $0xb0] sm:$0xff]  ;;  %p3597_p3 = pnand %p3596_p2, %p3590_p13 }
  0x25   : > { %2921 = vmatpush3.bf16.xpose.msra.mxu1 %v612_v23  ;;  %2993 = vmatprep.subr.msk.bf16.mxu0 %vm550_vm0, %v419_v18  ;;  %v567_v32 = vsel %vm550_vm0, %v411_v25, 0  ;;  %v436_v35 = vpack.c.bf16 %v335_v31, %v334_v30  ;;  %v286_v36 = vld [vmem:[%s3758_s21 + $0x20] sm:$0xff]  ;;  %v287_v37 = vld [vmem:[%s3758_s21 + $0x28] sm:$0xff]  ;;  %v305_v43 = vld [vmem:[%s3758_s21 + $0xb8] sm:$0xff] }
  0x26   : > { %3001 = vmatprep.subr.msk.bf16.mxu1 %vm550_vm0, %v435_v19  ;;  %v615_v34 = vsel %vm550_vm0, %v427_v26, 0  ;;  %v318_v38 = vld [vmem:[%s3758_s21 + $0x120] sm:$0xff]  ;;  %v319_v39 = vld [vmem:[%s3758_s21 + $0x128] sm:$0xff]  ;;  %v412_v40 = vpack.c.bf16 %v287_v37, %v286_v36  ;;  %v336_v44 = vld [vmem:[%s3758_s21 + $0x1b0] sm:$0xff]  ;;  %v421_v47 = vpack.c.bf16 %v305_v43, %v304_v42 }
  0x27   : > { %v428_v41 = vpack.c.bf16 %v319_v39, %v318_v38  ;;  %v337_v45 = vld [vmem:[%s3758_s21 + $0x1b8] sm:$0xff]  ;;  %v288_v50 = vld [vmem:[%s3758_s21 + $0x30] sm:$0xff]  ;;  %v306_v56 = vld [vmem:[%s3758_s21 + $0xc0] sm:$0xff] }
  0x28   : > { %v570_v46 = vsel %vm550_vm0, %v412_v40, 0  ;;  %v437_v49 = vpack.c.bf16 %v337_v45, %v336_v44  ;;  %v289_v51 = vld [vmem:[%s3758_s21 + $0x38] sm:$0xff]  ;;  %v320_v52 = vld [vmem:[%s3758_s21 + $0x130] sm:$0xff]  ;;  %v307_v57 = vld [vmem:[%s3758_s21 + $0xc8] sm:$0xff] }
  0x29   : > { %v618_v48 = vsel %vm550_vm0, %v428_v41, 0  ;;  %v321_v53 = vld [vmem:[%s3758_s21 + $0x138] sm:$0xff]  ;;  %v413_v54 = vpack.c.bf16 %v289_v51, %v288_v50  ;;  %v338_v58 = vld [vmem:[%s3758_s21 + $0x1c0] sm:$0xff]  ;;  %v339_v59 = vld [vmem:[%s3758_s21 + $0x1c8] sm:$0xff]  ;;  %v422_v61 = vpack.c.bf16 %v307_v57, %v306_v56 }
  0x2a   : > { %v429_v55 = vpack.c.bf16 %v321_v53, %v320_v52  ;;  %v438_v63 = vpack.c.bf16 %v339_v59, %v338_v58  ;;  %v290_v1 = vld [vmem:[%s3758_s21 + $0x40] sm:$0xff]  ;;  %v291_v2 = vld [vmem:[%s3758_s21 + $0x48] sm:$0xff]  ;;  %v308_v7 = vld [vmem:[%s3758_s21 + $0xd0] sm:$0xff] }
  0x2b   : > { %v573_v60 = vsel %vm550_vm0, %v413_v54, 0  ;;  %v322_v3 = vld [vmem:[%s3758_s21 + $0x140] sm:$0xff]  ;;  %v323_v4 = vld [vmem:[%s3758_s21 + $0x148] sm:$0xff]  ;;  %v414_v5 = vpack.c.bf16 %v291_v2, %v290_v1  ;;  %v309_v8 = vld [vmem:[%s3758_s21 + $0xd8] sm:$0xff] }
  0x2c   : > { %2899 = vmatpush3.bf16.xpose.msra.mxu0 %v567_v32  ;;  %v621_v62 = vsel %vm550_vm0, %v429_v55, 0  ;;  %v430_v6 = vpack.c.bf16 %v323_v4, %v322_v3  ;;  %v340_v9 = vld [vmem:[%s3758_s21 + $0x1d0] sm:$0xff]  ;;  %v341_v10 = vld [vmem:[%s3758_s21 + $0x1d8] sm:$0xff]  ;;  %v423_v12 = vpack.c.bf16 %v309_v8, %v308_v7  ;;  %v310_v21 = vld [vmem:[%s3758_s21 + $0xe0] sm:$0xff] }
  0x2d   : > { %2923 = vmatpush3.bf16.xpose.msra.mxu1 %v615_v34  ;;  %2994 = vmatprep.subr.msk.bf16.mxu0 %vm550_vm0, %v420_v33  ;;  %v576_v11 = vsel %vm550_vm0, %v414_v5, 0  ;;  %v439_v14 = vpack.c.bf16 %v341_v10, %v340_v9  ;;  %v292_v15 = vld [vmem:[%s3758_s21 + $0x50] sm:$0xff]  ;;  %v293_v16 = vld [vmem:[%s3758_s21 + $0x58] sm:$0xff]  ;;  %v311_v22 = vld [vmem:[%s3758_s21 + $0xe8] sm:$0xff] }
  0x2e   : > { %3002 = vmatprep.subr.msk.bf16.mxu1 %vm550_vm0, %v436_v35  ;;  %v624_v13 = vsel %vm550_vm0, %v430_v6, 0  ;;  %v324_v17 = vld [vmem:[%s3758_s21 + $0x150] sm:$0xff]  ;;  %v325_v18 = vld [vmem:[%s3758_s21 + $0x158] sm:$0xff]  ;;  %v415_v19 = vpack.c.bf16 %v293_v16, %v292_v15  ;;  %v342_v23 = vld [vmem:[%s3758_s21 + $0x1e0] sm:$0xff]  ;;  %v424_v26 = vpack.c.bf16 %v311_v22, %v310_v21 }
  0x2f   : > { %v431_v20 = vpack.c.bf16 %v325_v18, %v324_v17  ;;  %v343_v24 = vld [vmem:[%s3758_s21 + $0x1e8] sm:$0xff]  ;;  %v482_v27 = vld [vmem:[%s5235_s2] sm:$0xff]  ;;  %v484_v33 = vld [vmem:[%s5235_s2 + $0x10] sm:$0xff] }
  0x30   : > { %v579_v25 = vsel %vm550_vm0, %v415_v19, 0  ;;  %v440_v30 = vpack.c.bf16 %v343_v24, %v342_v23  ;;  %v294_v31 = vld [vmem:[%s3758_s21 + $0x60] sm:$0xff]  ;;  %v295_v32 = vld [vmem:[%s3758_s21 + $0x68] sm:$0xff]  ;;  %492 = vperm.xlu0 %3065, %v482_v27   ;;  %502 = vperm.xlu1 %3066, %v484_v33   ;;  %v485_v37 = vld [vmem:[%s5235_s2 + $0x18] sm:$0xff] }
  0x31   : > { %v627_v28 = vsel %vm550_vm0, %v431_v20, 0  ;;  %v326_v34 = vld [vmem:[%s3758_s21 + $0x160] sm:$0xff]  ;;  %v327_v35 = vld [vmem:[%s3758_s21 + $0x168] sm:$0xff]  ;;  %v416_v38 = vpack.c.bf16 %v295_v32, %v294_v31  ;;  %v312_v40 = vld [vmem:[%s3758_s21 + $0xf0] sm:$0xff] }
  0x32   : > { %v483_v36 = vld [vmem:[%s5235_s2 + $0x8] sm:$0xff]  ;;  %v432_v39 = vpack.c.bf16 %v327_v35, %v326_v34  ;;  %v313_v41 = vld [vmem:[%s3758_s21 + $0xf8] sm:$0xff]  ;;  %v344_v42 = vld [vmem:[%s3758_s21 + $0x1f0] sm:$0xff] }
  0x33   : > { %v345_v43 = vld [vmem:[%s3758_s21 + $0x1f8] sm:$0xff]  ;;  %v486_v44 = vld [vmem:[%s5235_s2 + $0x20] sm:$0xff]  ;;  %v487_v45 = vld [vmem:[%s5235_s2 + $0x28] sm:$0xff] }
  0x34   : > { %2901 = vmatpush3.bf16.xpose.msra.mxu0 %v570_v46  ;;  %497 = vperm.xlu0 %3065, %v483_v36   ;;  %v582_v46 = vsel %vm550_vm0, %v416_v38, 0  ;;  %v296_v50 = vld [vmem:[%s3758_s21 + $0x70] sm:$0xff]  ;;  %v297_v51 = vld [vmem:[%s3758_s21 + $0x78] sm:$0xff]  ;;  %v362_v58 = vld [vmem:[%s3758_s21 + $0x280] sm:$0xff] }
  0x35   : > { %2925 = vmatpush3.bf16.xpose.msra.mxu1 %v618_v48  ;;  %2995 = vmatprep.subr.msk.bf16.mxu0 %vm550_vm0, %v421_v47  ;;  %v425_v47 = vpack.c.bf16 %v313_v41, %v312_v40  ;;  %v630_v48 = vsel %vm550_vm0, %v432_v39, 0  ;;  %v328_v52 = vld [vmem:[%s3758_s21 + $0x170] sm:$0xff]  ;;  %v329_v53 = vld [vmem:[%s3758_s21 + $0x178] sm:$0xff]  ;;  %v417_v56 = vpack.c.bf16 %v297_v51, %v296_v50  ;;  %v363_v59 = vld [vmem:[%s3758_s21 + $0x288] sm:$0xff] }
  0x36   : > { %3003 = vmatprep.subr.msk.bf16.mxu1 %vm550_vm0, %v437_v49  ;;  %507 = vperm.xlu1 %3066, %v485_v37   ;;  %v441_v49 = vpack.c.bf16 %v345_v43, %v344_v42  ;;  %v488_v54 = vld [vmem:[%s5235_s2 + $0x30] sm:$0xff]  ;;  %v489_v55 = vld [vmem:[%s5235_s2 + $0x38] sm:$0xff]  ;;  %v433_v57 = vpack.c.bf16 %v329_v53, %v328_v52  ;;  %v450_v2 = vpack.c.bf16 %v363_v59, %v362_v58  ;;  %v346_v5 = vld [vmem:[%s3758_s21 + $0x200] sm:$0xff] }
  0x37   : > { %v585_v1 = vsel %vm550_vm0, %v417_v56, 0  ;;  %v347_v6 = vld [vmem:[%s3758_s21 + $0x208] sm:$0xff]  ;;  %v378_v7 = vld [vmem:[%s3758_s21 + $0x300] sm:$0xff]  ;;  %v1537_v9 = vld [vmem:[%s5237_s4 + $0x10] sm:$0xff] }
  0x38   : > { %512 = vperm.xlu0 %3065, %v486_v44   ;;  %v633_v3 = vsel %vm550_vm0, %v433_v57, 0  ;;  %v379_v8 = vld [vmem:[%s3758_s21 + $0x308] sm:$0xff]  ;;  %v1538_v10 = vld [vmem:[%s5237_s4 + $0x18] sm:$0xff]  ;;  %v1539_v15 = vld [vmem:[%s5237_s4 + $0x20] sm:$0xff] }
  0x39   : > { %v396_v16 = vld [vmem:[%s3758_s21 + $0x390] sm:$0xff]  ;;  %v397_v17 = vld [vmem:[%s3758_s21 + $0x398] sm:$0xff]  ;;  %v1540_v18 = vld [vmem:[%s5237_s4 + $0x28] sm:$0xff] }
  0x3a   : > { %517 = vperm.xlu1 %3066, %v487_v45   ;;  %v3918_v20 = vld [vmem:[%s5234_s1 + $0x8] sm:$0xff]   ;;  %v348_v23 = vld [vmem:[%s3758_s21 + $0x210] sm:$0xff]  ;;  %v349_v24 = vld [vmem:[%s3758_s21 + $0x218] sm:$0xff] }
  0x3b   : > { %v381_v27 = vld [vmem:[%s3758_s21 + $0x318] sm:$0xff]  ;;  %v366_v33 = vld [vmem:[%s3758_s21 + $0x2a0] sm:$0xff]  ;;  %v367_v34 = vld [vmem:[%s3758_s21 + $0x2a8] sm:$0xff] }
  0x3c   : > { %2903 = vmatpush3.bf16.xpose.msra.mxu0 %v573_v60  ;;  %522 = vperm.xlu0 %3065, %v488_v54   ;;  %v394_v60 = vld [vmem:[%s3758_s21 + $0x380] sm:$0xff]  ;;  %v1542_v31 = vld [vmem:[%s5237_s4 + $0x38] sm:$0xff]  ;;  %v399_v36 = vld [vmem:[%s3758_s21 + $0x3a8] sm:$0xff]  ;;  %v452_v41 = vpack.c.bf16 %v367_v34, %v366_v33 }
  0x3d   : > { %2927 = vmatpush3.bf16.xpose.msra.mxu1 %v621_v62  ;;  %2996 = vmatprep.subr.msk.bf16.mxu0 %vm550_vm0, %v422_v61  ;;  %v395_v61 = vld [vmem:[%s3758_s21 + $0x388] sm:$0xff]  ;;  %v1535_v62 = vld [vmem:[%s5237_s4] sm:$0xff]  ;;  %v3952_v39 = vld [vmem:[%s5234_s1 + $0x10] sm:$0xff]  }
  0x3e   : > { %3004 = vmatprep.subr.msk.bf16.mxu1 %vm550_vm0, %v438_v63  ;;  %527 = vperm.xlu1 %3066, %v489_v55   ;;  %v1536_v63 = vld [vmem:[%s5237_s4 + $0x8] sm:$0xff]  ;;  %v466_v4 = vpack.c.bf16 %v395_v61, %v394_v60  ;;  %v398_v35 = vld [vmem:[%s3758_s21 + $0x3a0] sm:$0xff]  ;;  %v368_v51 = vld [vmem:[%s3758_s21 + $0x2b0] sm:$0xff] }
  0x3f   : > { %v2356_v37 = vld [vmem:[%s5238_s5] sm:$0xff]  ;;  %v351_v43 = vld [vmem:[%s3758_s21 + $0x228] sm:$0xff]  ;;  %v468_v44 = vpack.c.bf16 %v399_v36, %v398_v35  ;;  %v369_v52 = vld [vmem:[%s3758_s21 + $0x2b8] sm:$0xff] }
  0x40   : > { %1545 = vperm.xlu0 %3065, %v1535_v62   ;;  %v350_v42 = vld [vmem:[%s3758_s21 + $0x220] sm:$0xff]  ;;  %v400_v53 = vld [vmem:[%s3758_s21 + $0x3b0] sm:$0xff]  ;;  %v401_v54 = vld [vmem:[%s3758_s21 + $0x3b8] sm:$0xff]  ;;  %v453_v59 = vpack.c.bf16 %v369_v52, %v368_v51 }
  0x41   : > { %v382_v45 = vld [vmem:[%s3758_s21 + $0x320] sm:$0xff]  ;;  %v3986_v57 = vld [vmem:[%s5234_s1 + $0x18] sm:$0xff]   ;;  %v352_v60 = vld [vmem:[%s3758_s21 + $0x230] sm:$0xff]  ;;  %v469_v62 = vpack.c.bf16 %v401_v54, %v400_v53 }
  0x42   : > { %1550 = vperm.xlu1 %3066, %v1536_v63   ;;  %v2360_v55 = vld [vmem:[%s5238_s5 + $0x20] sm:$0xff]  ;;  %v353_v61 = vld [vmem:[%s3758_s21 + $0x238] sm:$0xff]  ;;  %v384_v63 = vld [vmem:[%s3758_s21 + $0x330] sm:$0xff] }
  0x43   : > { %v357_v33 = vld [vmem:[%s3758_s21 + $0x258] sm:$0xff]  ;;  %v388_v34 = vld [vmem:[%s3758_s21 + $0x350] sm:$0xff] }
  0x44   : > { %2905 = vmatpush3.bf16.xpose.msra.mxu0 %v576_v11  ;;  %v442_v11 = vpack.c.bf16 %v347_v6, %v346_v5  ;;  %1555 = vperm.xlu0 %3065, %v1537_v9   ;;  %v370_v6 = vld [vmem:[%s3758_s21 + $0x2c0] sm:$0xff]  ;;  %v403_v9 = vld [vmem:[%s3758_s21 + $0x3c8] sm:$0xff]  ;;  %v389_v35 = vld [vmem:[%s3758_s21 + $0x358] sm:$0xff] }
  0x45   : > { %2929 = vmatpush3.bf16.xpose.msra.mxu1 %v624_v13  ;;  %2997 = vmatprep.subr.msk.bf16.mxu0 %vm550_vm0, %v423_v12  ;;  %v458_v12 = vpack.c.bf16 %v379_v8, %v378_v7  ;;  %v364_v13 = vld [vmem:[%s3758_s21 + $0x290] sm:$0xff]  ;;  %v371_v7 = vld [vmem:[%s3758_s21 + $0x2c8] sm:$0xff]  ;;  %v402_v8 = vld [vmem:[%s3758_s21 + $0x3c0] sm:$0xff] }
  0x46   : > { %3005 = vmatprep.subr.msk.bf16.mxu1 %vm550_vm0, %v439_v14  ;;  %v365_v14 = vld [vmem:[%s3758_s21 + $0x298] sm:$0xff]  ;;  %1560 = vperm.xlu1 %3066, %v1538_v10   ;;  %v660_v19 = vsel %vm550_vm0, %v442_v11, 0  ;;  %v2361_v10 = vld [vmem:[%s5238_s5 + $0x28] sm:$0xff]  ;;  %v376_v53 = vld [vmem:[%s3758_s21 + $0x2f0] sm:$0xff] }
  0x47   : > { %v708_v21 = vsel %vm550_vm0, %v458_v12, 0  ;;  %v451_v22 = vpack.c.bf16 %v365_v14, %v364_v13  ;;  %v454_v12 = vpack.c.bf16 %v371_v7, %v370_v6  ;;  %v470_v14 = vpack.c.bf16 %v403_v9, %v402_v8  ;;  %v377_v54 = vld [vmem:[%s3758_s21 + $0x2f8] sm:$0xff] }
  0x48   : > { %1565 = vperm.xlu0 %3065, %v1539_v15   ;;  %v354_v15 = vld [vmem:[%s3758_s21 + $0x240] sm:$0xff] }
  0x4a   : > { %1570 = vperm.xlu1 %3066, %v1540_v18   ;;  %v387_v18 = vld [vmem:[%s3758_s21 + $0x348] sm:$0xff] }
  0x4c   : > { %2907 = vmatpush3.bf16.xpose.msra.mxu0 %v579_v25  ;;  %v467_v25 = vpack.c.bf16 %v397_v17, %v396_v16  ;;  %v355_v16 = vld [vmem:[%s3758_s21 + $0x248] sm:$0xff]  ;;  %v386_v17 = vld [vmem:[%s3758_s21 + $0x340] sm:$0xff] }
  0x4d   : > { %2931 = vmatpush3.bf16.xpose.msra.mxu1 %v627_v28  ;;  %2998 = vmatprep.subr.msk.bf16.mxu0 %vm550_vm0, %v424_v26  ;;  %v380_v26 = vld [vmem:[%s3758_s21 + $0x310] sm:$0xff] }
  0x4e   : > { %3006 = vmatprep.subr.msk.bf16.mxu1 %vm550_vm0, %v440_v30  ;;  %v1541_v28 = vld [vmem:[%s5237_s4 + $0x30] sm:$0xff]  ;;  %v443_v30 = vpack.c.bf16 %v349_v24, %v348_v23  ;;  %v459_v32 = vpack.c.bf16 %v381_v27, %v380_v26  ;;  %1580 = vperm.xlu1 %3066, %v1542_v31   ;;  %v373_v24 = vld [vmem:[%s3758_s21 + $0x2d8] sm:$0xff] }
  0x4f   : > { %1575 = vperm.xlu0 %3065, %v1541_v28   ;;  %v372_v23 = vld [vmem:[%s3758_s21 + $0x2d0] sm:$0xff]  ;;  %v405_v26 = vld [vmem:[%s3758_s21 + $0x3d8] sm:$0xff] }
  0x50   : > { %v663_v38 = vsel %vm550_vm0, %v443_v30, 0  ;;  %v711_v40 = vsel %vm550_vm0, %v459_v32, 0  ;;  %v455_v28 = vpack.c.bf16 %v373_v24, %v372_v23  ;;  %v356_v32 = vld [vmem:[%s3758_s21 + $0x250] sm:$0xff] }
  0x51   : > { %v447_v36 = vpack.c.bf16 %v357_v33, %v356_v32 }
  0x53   : > { %2366 = vperm.xlu0 %3065, %v2356_v37   ;;  %v463_v37 = vpack.c.bf16 %v389_v35, %v388_v34 }
  0x54   : > { %2909 = vmatpush3.bf16.xpose.msra.mxu0 %v582_v46  ;;  %v383_v46 = vld [vmem:[%s3758_s21 + $0x328] sm:$0xff] }
  0x55   : > { %2933 = vmatpush3.bf16.xpose.msra.mxu1 %v630_v48  ;;  %2999 = vmatprep.subr.msk.bf16.mxu0 %vm550_vm0, %v425_v47  ;;  %v2358_v47 = vld [vmem:[%s5238_s5 + $0x10] sm:$0xff]  ;;  %v444_v48 = vpack.c.bf16 %v351_v43, %v350_v42  ;;  %v460_v50 = vpack.c.bf16 %v383_v46, %v382_v45  ;;  %v407_v42 = vld [vmem:[%s3758_s21 + $0x3e8] sm:$0xff]  ;;  %v675_v43 = vsel %vm550_vm0, %v447_v36, 0  ;;  %v723_v45 = vsel %vm550_vm0, %v463_v37, 0 }
  0x56   : > { %3007 = vmatprep.subr.msk.bf16.mxu1 %vm550_vm0, %v441_v49  ;;  %v2357_v49 = vld [vmem:[%s5238_s5 + $0x8] sm:$0xff] }
  0x57   : > { %2376 = vperm.xlu0 %3065, %v2358_v47   ;;  %2371 = vperm.xlu1 %3066, %v2357_v49   ;;  %v666_v56 = vsel %vm550_vm0, %v444_v48, 0  ;;  %v714_v58 = vsel %vm550_vm0, %v460_v50, 0  ;;  %v358_v47 = vld [vmem:[%s3758_s21 + $0x260] sm:$0xff]  ;;  %v359_v48 = vld [vmem:[%s3758_s21 + $0x268] sm:$0xff] }
  0x58   : > { %v390_v49 = vld [vmem:[%s3758_s21 + $0x360] sm:$0xff]  ;;  %v391_v50 = vld [vmem:[%s3758_s21 + $0x368] sm:$0xff]  ;;  %v448_v51 = vpack.c.bf16 %v359_v48, %v358_v47 }
  0x59   : > { %v464_v52 = vpack.c.bf16 %v391_v50, %v390_v49 }
  0x5b   : > { %2386 = vperm.xlu0 %3065, %v2360_v55   ;;  %v408_v55 = vld [vmem:[%s3758_s21 + $0x3f0] sm:$0xff] }
  0x5c   : > { %2911 = vmatpush3.bf16.xpose.msra.mxu0 %v585_v1  ;;  %v385_v1 = vld [vmem:[%s3758_s21 + $0x338] sm:$0xff] }
  0x5d   : > { %2935 = vmatpush3.bf16.xpose.msra.mxu1 %v633_v3  ;;  %3008 = vmatprep.subr.msk.bf16.mxu0 %vm550_vm0, %v450_v2  ;;  %v2359_v2 = vld [vmem:[%s5238_s5 + $0x18] sm:$0xff]  ;;  %v445_v3 = vpack.c.bf16 %v353_v61, %v352_v60  ;;  %v461_v5 = vpack.c.bf16 %v385_v1, %v384_v63  ;;  %v726_v60 = vsel %vm550_vm0, %v464_v52, 0  ;;  %v392_v1 = vld [vmem:[%s3758_s21 + $0x370] sm:$0xff] }
  0x5e   : > { %3016 = vmatprep.subr.msk.bf16.mxu1 %vm550_vm0, %v466_v4  ;;  %v2362_v4 = vld [vmem:[%s5238_s5 + $0x30] sm:$0xff]  ;;  %2381 = vperm.xlu1 %3066, %v2359_v2   ;;  %v361_v63 = vld [vmem:[%s3758_s21 + $0x278] sm:$0xff] }
  0x5f   : > { %2396 = vperm.xlu0 %3065, %v2362_v4   ;;  %v669_v11 = vsel %vm550_vm0, %v445_v3, 0  ;;  %v717_v13 = vsel %vm550_vm0, %v461_v5, 0  ;;  %v393_v2 = vld [vmem:[%s3758_s21 + $0x378] sm:$0xff] }
  0x60   : > { %v465_v4 = vpack.c.bf16 %v393_v2, %v392_v1 }
  0x62   : > { %2391 = vperm.xlu1 %3066, %v2361_v10   ;;  %v729_v6 = vsel %vm550_vm0, %v465_v4, 0 }
  0x63   : > { %2913 = vmatmul.mubr.msk.bf16.vlgmr.msra.gmra.mrb[0].mxu0 %vm550_vm0, %v3748_v0 }
  0x64   : > { %2937 = vmatmul.mubr.msk.bf16.vlgmr.msra.gmra.mrb[0].mxu1 %vm550_vm0, %v3748_v0  ;;  %2945 = vmatpush3.bf16.xpose.msra.mxu0 %v660_v19  ;;  %v2363_v19 = vld [vmem:[%s5238_s5 + $0x38] sm:$0xff] }
  0x65   : > { %2969 = vmatpush3.bf16.xpose.msra.mxu1 %v708_v21  ;;  %2914 = vmatprep.mubr.msk.bf16.mxu0 %vm550_vm0, %v3918_v20  ;;  %v446_v21 = vpack.c.bf16 %v355_v16, %v354_v15 }
  0x66   : > { %2938 = vmatprep.mubr.msk.bf16.mxu1 %vm550_vm0, %v3918_v20  ;;  %3009 = vmatprep.subr.msk.bf16.mxu0 %vm550_vm0, %v451_v22  ;;  %v462_v22 = vpack.c.bf16 %v387_v18, %v386_v17 }
  0x67   : > { %3017 = vmatprep.subr.msk.bf16.mxu1 %vm550_vm0, %v467_v25  ;;  %v404_v25 = vld [vmem:[%s3758_s21 + $0x3d0] sm:$0xff]  ;;  %2401 = vperm.xlu1 %3066, %v2363_v19   ;;  %v672_v27 = vsel %vm550_vm0, %v446_v21, 0 }
  0x68   : > { %v720_v30 = vsel %vm550_vm0, %v462_v22, 0  ;;  %v471_v31 = vpack.c.bf16 %v405_v26, %v404_v25 }
  0x6b   : > { %2915 = vmatmul.mubr.msk.bf16.gmra.mrb[4].mxu0 %vm550_vm0, %v3918_v20 }
  0x6c   : > { %2939 = vmatmul.mubr.msk.bf16.gmra.mrb[4].mxu1 %vm550_vm0, %v3918_v20  ;;  %2947 = vmatpush3.bf16.xpose.msra.mxu0 %v663_v38  ;;  %v374_v38 = vld [vmem:[%s3758_s21 + $0x2e0] sm:$0xff] }
  0x6d   : > { %2971 = vmatpush3.bf16.xpose.msra.mxu1 %v711_v40  ;;  %2916 = vmatprep.mubr.msk.bf16.mxu0 %vm550_vm0, %v3952_v39  ;;  %v375_v40 = vld [vmem:[%s3758_s21 + $0x2e8] sm:$0xff] }
  0x6e   : > { %2940 = vmatprep.mubr.msk.bf16.mxu1 %vm550_vm0, %v3952_v39  ;;  %3010 = vmatprep.subr.msk.bf16.mxu0 %vm550_vm0, %v452_v41  ;;  %v406_v41 = vld [vmem:[%s3758_s21 + $0x3e0] sm:$0xff] }
  0x6f   : > { %3018 = vmatprep.subr.msk.bf16.mxu1 %vm550_vm0, %v468_v44  ;;  %v456_v44 = vpack.c.bf16 %v375_v40, %v374_v38  ;;  %v472_v46 = vpack.c.bf16 %v407_v42, %v406_v41 }
  0x73   : > { %2917 = vmatmul.mubr.msk.bf16.gmra.mrb[8].mxu0 %vm550_vm0, %v3952_v39 }
  0x74   : > { %2941 = vmatmul.mubr.msk.bf16.gmra.mrb[8].mxu1 %vm550_vm0, %v3952_v39  ;;  %2949 = vmatpush3.bf16.xpose.msra.mxu0 %v666_v56  ;;  %v409_v56 = vld [vmem:[%s3758_s21 + $0x3f8] sm:$0xff] }
  0x75   : > { %2973 = vmatpush3.bf16.xpose.msra.mxu1 %v714_v58  ;;  %2918 = vmatprep.mubr.msk.bf16.mxu0 %vm550_vm0, %v3986_v57  ;;  %v678_v58 = vsel %vm550_vm0, %v448_v51, 0  ;;  %v473_v61 = vpack.c.bf16 %v409_v56, %v408_v55 }
  0x76   : > { %2942 = vmatprep.mubr.msk.bf16.mxu1 %vm550_vm0, %v3986_v57  ;;  %3011 = vmatprep.subr.msk.bf16.mxu0 %vm550_vm0, %v453_v59  ;;  %v457_v59 = vpack.c.bf16 %v377_v54, %v376_v53 }
  0x77   : > { %3019 = vmatprep.subr.msk.bf16.mxu1 %vm550_vm0, %v469_v62  ;;  %v360_v62 = vld [vmem:[%s3758_s21 + $0x270] sm:$0xff]  ;;  %s5191_s21 = scalar_lea.hbm %s5240_s7, %s3742_s14 }
  0x78   : > { %v449_v3 = vpack.c.bf16 %v361_v63, %v360_v62 }
  0x7a   : > { %v681_v5 = vsel %vm550_vm0, %v449_v3, 0 }
  0x7b   : > { %2919 = vmatmul.mubr.msk.bf16.gmra.mrb[12].mxu0 %vm550_vm0, %v3986_v57 }
  0x7c   : > { %2943 = vmatmul.mubr.msk.bf16.gmra.mrb[12].mxu1 %vm550_vm0, %v3986_v57  ;;  %2951 = vmatpush3.bf16.xpose.msra.mxu0 %v669_v11 }
  0x7d   : > { %2975 = vmatpush3.bf16.xpose.msra.mxu1 %v717_v13  ;;  %3012 = vmatprep.subr.msk.bf16.mxu0 %vm550_vm0, %v454_v12 }
  0x7e   : > { %3020 = vmatprep.subr.msk.bf16.mxu1 %vm550_vm0, %v470_v14  ;;  %2960 = vmatprep.mubr.msk.bf16.mxu0 %vm550_vm0, %v3748_v0 }
  0x7f   : > { %2984 = vmatprep.mubr.msk.bf16.mxu1 %vm550_vm0, %v3748_v0 }
  0x84   : > { %2953 = vmatpush3.bf16.xpose.msra.mxu0 %v672_v27 }
  0x85   : > { %2977 = vmatpush3.bf16.xpose.msra.mxu1 %v720_v30  ;;  %3013 = vmatprep.subr.msk.bf16.mxu0 %vm550_vm0, %v455_v28 }
  0x86   : > { %3021 = vmatprep.subr.msk.bf16.mxu1 %vm550_vm0, %v471_v31 }
  0x8c   : > { %2955 = vmatpush3.bf16.xpose.msra.mxu0 %v675_v43 }
  0x8d   : > { %2979 = vmatpush3.bf16.xpose.msra.mxu1 %v723_v45  ;;  %3014 = vmatprep.subr.msk.bf16.mxu0 %vm550_vm0, %v456_v44 }
  0x8e   : > { %3022 = vmatprep.subr.msk.bf16.mxu1 %vm550_vm0, %v472_v46 }
  0x94   : > { %2957 = vmatpush3.bf16.xpose.msra.mxu0 %v678_v58 }
  0x95   : > { %2981 = vmatpush3.bf16.xpose.msra.mxu1 %v726_v60  ;;  %3015 = vmatprep.subr.msk.bf16.mxu0 %vm550_vm0, %v457_v59 }
  0x96   : > { %3023 = vmatprep.subr.msk.bf16.mxu1 %vm550_vm0, %v473_v61 }
  0x9c   : > { %2959 = vmatpush3.bf16.xpose.msra.mxu0 %v681_v5 }
  0x9d   : > { %2983 = vmatpush3.bf16.xpose.msra.mxu1 %v729_v6 }
  0xa3   : > { %2961 = vmatmul.mubr.msk.bf16.vlgmr.msra.gmra.mrb[16].mxu0 %vm550_vm0, %v3748_v0 }
  0xa4   : > { %2985 = vmatmul.mubr.msk.bf16.vlgmr.msra.gmra.mrb[16].mxu1 %vm550_vm0, %v3748_v0  ;;  %2962 = vmatprep.mubr.msk.bf16.mxu0 %vm550_vm0, %v3918_v20 }
  0xa5   : > { %2986 = vmatprep.mubr.msk.bf16.mxu1 %vm550_vm0, %v3918_v20 }
  0xab   : > { %2963 = vmatmul.mubr.msk.bf16.gmra.mrb[20].mxu0 %vm550_vm0, %v3918_v20 }
  0xac   : > { %2987 = vmatmul.mubr.msk.bf16.gmra.mrb[20].mxu1 %vm550_vm0, %v3918_v20  ;;  %2964 = vmatprep.mubr.msk.bf16.mxu0 %vm550_vm0, %v3952_v39 }
  0xad   : > { %2988 = vmatprep.mubr.msk.bf16.mxu1 %vm550_vm0, %v3952_v39 }
  0xaf   : > { %v4103_v0 = vpop.permute.xlu0 %492  ;;  %v4105_v20 = vpop.permute.xlu1 %502 }
  0xb3   : > { %2965 = vmatmul.mubr.msk.bf16.gmra.mrb[24].mxu0 %vm550_vm0, %v3952_v39 }
  0xb4   : > { %2989 = vmatmul.mubr.msk.bf16.gmra.mrb[24].mxu1 %vm550_vm0, %v3952_v39  ;;  %2966 = vmatprep.mubr.msk.bf16.mxu0 %vm550_vm0, %v3986_v57  ;;  %v4107_v39 = vpop.permute.xlu0 %497 }
  0xb5   : > { %2990 = vmatprep.mubr.msk.bf16.mxu1 %vm550_vm0, %v3986_v57  ;;  %v4140_v31 = vpop.permute.xlu1 %507 }
  0xbb   : > { %2967 = vmatmul.mubr.msk.bf16.gmra.mrb[28].mxu0 %vm550_vm0, %v3986_v57 }
  0xbc   : > { %2991 = vmatmul.mubr.msk.bf16.gmra.mrb[28].mxu1 %vm550_vm0, %v3986_v57  ;;  %1648 = vmatprep.mubr.bf16.mxu0 %v3651_v29 }
  0xbd   : > { %1721 = vmatprep.mubr.bf16.mxu1 %v3651_v29 }
 0x136   : > { %v789_v7 = vpop.f32.mrb[0].mxu0 }
 0x137   : > { %v4110_v8 = vadd.f32 %v789_v7, %v4103_v0  ;;  %v862_v9 = vpop.f32.mrb[0].mxu1  ;;  %v791_v10 = vpop.f32.mrb[1].mxu0 }
 0x138   : > { %v4113_v11 = vadd.f32 %v862_v9, %v4103_v0  ;;  %v4116_v57 = vadd.f32 %v791_v10, %v4103_v0  ;;  %v864_v12 = vpop.f32.mrb[1].mxu1  ;;  %v793_v13 = vpop.f32.mrb[2].mxu0 }
 0x139   : > { %v2742_v14 = vmul.f32 -1.442695, %v4110_v8  ;;  %v4120_v15 = vadd.f32 %v864_v12, %v4103_v0  ;;  %v4123_v16 = vadd.f32 %v793_v13, %v4107_v39  ;;  %v866_v17 = vpop.f32.mrb[2].mxu1  ;;  %v795_v18 = vpop.f32.mrb[3].mxu0 }
 0x13a   : > { %v2744_v19 = vmul.f32 -1.442695, %v4113_v11  ;;  %v2743_v21 = vmul.f32 -1.442695, %v4116_v57  ;;  %v4128_v22 = vadd.f32 %v866_v17, %v4107_v39  ;;  %v4131_v23 = vadd.f32 %v795_v18, %v4107_v39  ;;  %v868_v24 = vpop.f32.mrb[3].mxu1 }
 0x13b   : > { %3075 = vpow2.f32 %v2742_v14  ;;  %v2745_v25 = vmul.f32 -1.442695, %v4120_v15  ;;  %v2750_v26 = vmul.f32 -1.442695, %v4123_v16  ;;  %v4136_v27 = vadd.f32 %v868_v24, %v4107_v39 }
 0x13c   : > { %3077 = vpow2.f32 %v2744_v19  ;;  %v2752_v28 = vmul.f32 -1.442695, %v4128_v22  ;;  %v2751_v30 = vmul.f32 -1.442695, %v4131_v23 }
 0x13d   : > { %3079 = vpow2.f32 %v2743_v21  ;;  %v2753_v32 = vmul.f32 -1.442695, %v4136_v27  ;;  %v4171_v21 = vpop.permute.xlu0 %512 }
 0x13e   : > { %3081 = vpow2.f32 %v2745_v25  ;;  %v799_v33 = vpop.f32.mrb[4].mxu0 }
 0x13f   : > { %3083 = vpow2.f32 %v2750_v26  ;;  %v4144_v34 = vadd.f32 %v799_v33, %v4105_v20  ;;  %v872_v35 = vpop.f32.mrb[4].mxu1  ;;  %v801_v36 = vpop.f32.mrb[5].mxu0 }
 0x140   : > { %3085 = vpow2.f32 %v2752_v28  ;;  %v4147_v37 = vadd.f32 %v872_v35, %v4105_v20  ;;  %v4150_v38 = vadd.f32 %v801_v36, %v4105_v20  ;;  %v874_v40 = vpop.f32.mrb[5].mxu1  ;;  %v803_v41 = vpop.f32.mrb[6].mxu0 }
 0x141   : > { %3087 = vpow2.f32 %v2751_v30  ;;  %v2758_v42 = vmul.f32 -1.442695, %v4144_v34  ;;  %v4154_v43 = vadd.f32 %v874_v40, %v4105_v20  ;;  %v4157_v44 = vadd.f32 %v803_v41, %v4140_v31  ;;  %v876_v45 = vpop.f32.mrb[6].mxu1  ;;  %v805_v46 = vpop.f32.mrb[7].mxu0 }
 0x142   : > { %3089 = vpow2.f32 %v2753_v32  ;;  %v2760_v47 = vmul.f32 -1.442695, %v4147_v37  ;;  %v2759_v48 = vmul.f32 -1.442695, %v4150_v38  ;;  %v878_v49 = vpop.f32.mrb[7].mxu1  ;;  %v4164_v9 = vadd.f32 %v876_v45, %v4140_v31  ;;  %v4173_v26 = vpop.permute.xlu1 %517 }
 0x143   : > { %3091 = vpow2.f32 %v2758_v42  ;;  %v2761_v50 = vmul.f32 -1.442695, %v4154_v43  ;;  %v2766_v51 = vmul.f32 -1.442695, %v4157_v44  ;;  %v4169_v14 = vadd.f32 %v805_v46, %v4140_v31 }
 0x144   : > { %3093 = vpow2.f32 %v2760_v47  ;;  %v2768_v30 = vmul.f32 -1.442695, %v4164_v9  ;;  %v4177_v32 = vadd.f32 %v878_v49, %v4140_v31 }
 0x145   : > { %v3076_v52 = vpop.eup %3075  ;;  %3095 = vpow2.f32 %v2759_v48  ;;  %v2767_v40 = vmul.f32 -1.442695, %v4169_v14 }
 0x146   : > { %v3078_v53 = vpop.eup %3077  ;;  %v1239_v54 = vadd.f32 1.0, %v3076_v52  ;;  %3097 = vpow2.f32 %v2761_v50  ;;  %v809_v55 = vpop.f32.mrb[8].mxu0 }
 0x147   : > { %v3080_v56 = vpop.eup %3079  ;;  %v1241_v58 = vadd.f32 1.0, %v3078_v53  ;;  %3099 = vpow2.f32 %v2766_v51  ;;  %v882_v59 = vpop.f32.mrb[8].mxu1  ;;  %v4181_v41 = vadd.f32 %v809_v55, %v4171_v21 }
 0x148   : > { %v811_v60 = vpop.f32.mrb[9].mxu0  ;;  %v3082_v61 = vpop.eup %3081  ;;  %3101 = vrcp.f32 %v1239_v54  ;;  %v1240_v62 = vadd.f32 1.0, %v3080_v56  ;;  %v4186_v48 = vadd.f32 %v882_v59, %v4171_v21 }
 0x149   : > { %v884_v63 = vpop.f32.mrb[9].mxu1  ;;  %v813_v1 = vpop.f32.mrb[10].mxu0  ;;  %3103 = vrcp.f32 %v1241_v58  ;;  %v1242_v3 = vadd.f32 1.0, %v3082_v61  ;;  %v4189_v49 = vadd.f32 %v811_v60, %v4171_v21 }
 0x14a   : > { %v3084_v2 = vpop.eup %3083  ;;  %v886_v4 = vpop.f32.mrb[10].mxu1  ;;  %3105 = vrcp.f32 %v1240_v62  ;;  %v4196_v54 = vadd.f32 %v884_v63, %v4171_v21  ;;  %v4199_v55 = vadd.f32 %v813_v1, %v4173_v26  ;;  %v2769_v1 = vmul.f32 -1.442695, %v4177_v32 }
 0x14b   : > { %v815_v5 = vpop.f32.mrb[11].mxu0  ;;  %v3086_v6 = vpop.eup %3085  ;;  %v1247_v7 = vadd.f32 1.0, %v3084_v2  ;;  %3107 = vrcp.f32 %v1242_v3  ;;  %v4206_v61 = vadd.f32 %v886_v4, %v4173_v26  ;;  %v2775_v4 = vmul.f32 -1.442695, %v4189_v49 }
 0x14c   : > { %v4166_v10 = vpop.f32.mrb[11].mxu1  ;;  %v3088_v12 = vpop.eup %3087  ;;  %v1249_v13 = vadd.f32 1.0, %v3086_v6  ;;  %v4209_v62 = vadd.f32 %v815_v5, %v4173_v26  ;;  %v2774_v6 = vmul.f32 -1.442695, %v4181_v41  ;;  %v2782_v5 = vmul.f32 -1.442695, %v4199_v55 }
 0x14d   : > { %v3090_v17 = vpop.eup %3089  ;;  %3109 = vrcp.f32 %v1247_v7  ;;  %v1248_v18 = vadd.f32 1.0, %v3088_v12  ;;  %v2776_v7 = vmul.f32 -1.442695, %v4186_v48 }
 0x14e   : > { %v3092_v19 = vpop.eup %3091  ;;  %3111 = vrcp.f32 %v1249_v13  ;;  %v1250_v24 = vadd.f32 1.0, %v3090_v17  ;;  %v819_v33 = vpop.f32.mrb[12].mxu0  ;;  %v2777_v13 = vmul.f32 -1.442695, %v4196_v54 }
 0x14f   : > { %v3094_v25 = vpop.eup %3093  ;;  %3113 = vrcp.f32 %v1248_v18  ;;  %v1255_v28 = vadd.f32 1.0, %v3092_v19  ;;  %v892_v42 = vpop.f32.mrb[12].mxu1  ;;  %v2784_v19 = vmul.f32 -1.442695, %v4206_v61 }
 0x150   : > { %v3096_v35 = vpop.eup %3095  ;;  %3115 = vrcp.f32 %v1250_v24  ;;  %v1257_v36 = vadd.f32 1.0, %v3094_v25  ;;  %v4183_v45 = vpop.f32.mrb[13].mxu0  ;;  %v2783_v24 = vmul.f32 -1.442695, %v4209_v62  ;;  %v4225_v25 = vadd.f32 %v4166_v10, %v4173_v26 }
 0x151   : > { %v3098_v46 = vpop.eup %3097  ;;  %3117 = vrcp.f32 %v1255_v28  ;;  %v1256_v47 = vadd.f32 1.0, %v3096_v35  ;;  %v4191_v50 = vpop.f32.mrb[13].mxu1 }
 0x152   : > { %v4193_v51 = vpop.f32.mrb[14].mxu0  ;;  %v3100_v52 = vpop.eup %3099  ;;  %3119 = vrcp.f32 %v1257_v36  ;;  %v1258_v53 = vadd.f32 1.0, %v3098_v46 }
 0x153   : > { %v4201_v56 = vpop.f32.mrb[14].mxu1  ;;  %v4203_v58 = vpop.f32.mrb[15].mxu0  ;;  %3121 = vrcp.f32 %v1256_v47  ;;  %v1263_v60 = vadd.f32 1.0, %v3100_v52 }
 0x154   : > { %v3102_v59 = vpop.eup %3101  ;;  %v4211_v2 = vpop.f32.mrb[15].mxu1  ;;  %3123 = vrcp.f32 %v1258_v53 }
 0x155   : > { %v3104_v63 = vpop.eup %3103  ;;  %3125 = vrcp.f32 %v1263_v60  ;;  %v4219_v18 = vpop.permute.xlu0 %522 }
 0x156   : > { %v3106_v3 = vpop.eup %3105  ;;  %3127 = vpow2.f32 %v2768_v30  ;;  %v1431_v30 = vmul.f32 %v3102_v59, %v4110_v8  ;;  %v4230_v36 = vadd.f32 %v819_v33, %v4219_v18  ;;  %v4235_v52 = vadd.f32 %v892_v42, %v4219_v18 }
 0x157   : > { %v3108_v12 = vpop.eup %3107  ;;  %3129 = vpow2.f32 %v2767_v40  ;;  %v1433_v40 = vmul.f32 %v3104_v63, %v4113_v11  ;;  %v1432_v53 = vmul.f32 %v3106_v3, %v4116_v57 }
 0x158   : > { %v3110_v17 = vpop.eup %3109  ;;  %3131 = vpow2.f32 %v2769_v1  ;;  %v1434_v33 = vmul.f32 %v3108_v12, %v4120_v15  ;;  %v2790_v57 = vmul.f32 -1.442695, %v4230_v36  ;;  %v2792_v15 = vmul.f32 -1.442695, %v4235_v52 }
 0x159   : > { %v3112_v28 = vpop.eup %3111  ;;  %v1439_v35 = vmul.f32 %v3110_v17, %v4123_v16  ;;  %3133 = vpow2.f32 %v2774_v6 }
 0x15a   : > { %v3114_v46 = vpop.eup %3113  ;;  %v1441_v47 = vmul.f32 %v3112_v28, %v4128_v22  ;;  %3135 = vpow2.f32 %v2776_v7  ;;  %v2785_v22 = vmul.f32 -1.442695, %v4225_v25 }
 0x15b   : > { %v3116_v10 = vpop.eup %3115  ;;  %v1503_v60 = vpack.c.bf16 %v1439_v35, %v1431_v30  ;;  %v1440_v8 = vmul.f32 %v3114_v46, %v4131_v23  ;;  %3137 = vpow2.f32 %v2775_v4 }
 0x15c   : > { %v3118_v16 = vpop.eup %3117  ;;  %v1505_v59 = vpack.c.bf16 %v1441_v47, %v1433_v40  ;;  %v1442_v1 = vmul.f32 %v3116_v10, %v4136_v27  ;;  %3139 = vpow2.f32 %v2777_v13 }
 0x15d   : > { %v3120_v11 = vpop.eup %3119  ;;  %v1504_v42 = vpack.c.bf16 %v1440_v8, %v1432_v53  ;;  %3141 = vpow2.f32 %v2782_v5  ;;  %v4246_v23 = vmul.f32 %v3118_v16, %v4144_v34  ;;  %v4256_v8 = vadd.f32 %v4183_v45, %v4219_v18 }
 0x15e   : > { %v3122_v63 = vpop.eup %3121  ;;  %v1506_v3 = vpack.c.bf16 %v1442_v1, %v1434_v33  ;;  %3143 = vpow2.f32 %v2784_v19  ;;  %v4258_v33 = vpop.permute.xlu1 %527  ;;  %v4262_v1 = vadd.f32 %v4191_v50, %v4219_v18 }
 0x15f   : > { %v4243_v6 = vpop.eup %3123  ;;  %1616 = vmatprep.subr.bf16.mxu0 %v1504_v42  ;;  %3145 = vpow2.f32 %v2783_v24  ;;  %v2791_v50 = vmul.f32 -1.442695, %v4256_v8 }
 0x160   : > { %v3126_v27 = vpop.eup %3125  ;;  %1689 = vmatprep.subr.bf16.mxu1 %v1506_v3  ;;  %1617 = vmatpush1.bf16.msra.mxu0 %v1503_v60  ;;  %3147 = vpow2.f32 %v2785_v22 }
 0x161   : > { %v3128_v7 = vpop.eup %3127  ;;  %v4250_v12 = vmul.f32 %v3126_v27, %v4157_v44  ;;  %1690 = vmatpush1.bf16.msra.mxu1 %v1505_v59  ;;  %3149 = vpow2.f32 %v2790_v57  ;;  %v4266_v57 = vadd.f32 %v4193_v51, %v4258_v33  ;;  %v1448_v51 = vmul.f32 %v3122_v63, %v4150_v38 }
 0x162   : > { %v3130_v4 = vpop.eup %3129  ;;  %v1265_v13 = vadd.f32 1.0, %v3128_v7  ;;  %3151 = vpow2.f32 %v2792_v15  ;;  %v4270_v15 = vadd.f32 %v4201_v56, %v4258_v33  ;;  %v1449_v7 = vmul.f32 %v3120_v11, %v4147_v37 }
 0x163   : > { %v3132_v5 = vpop.eup %3131  ;;  %v1511_v34 = vpack.c.bf16 %v4250_v12, %v4246_v23  ;;  %v1264_v17 = vadd.f32 1.0, %v3130_v4  ;;  %v4276_v4 = vadd.f32 %v4203_v58, %v4258_v33  ;;  %v4282_v56 = vadd.f32 %v4211_v2, %v4258_v33 }
 0x164   : > { %v3134_v19 = vpop.eup %3133  ;;  %3153 = vrcp.f32 %v1265_v13  ;;  %v1266_v24 = vadd.f32 1.0, %v3132_v5  ;;  %v2793_v5 = vmul.f32 -1.442695, %v4262_v1  ;;  %v1450_v37 = vmul.f32 %v4243_v6, %v4154_v43 }
 0x165   : > { %v3136_v28 = vpop.eup %3135  ;;  %3155 = vrcp.f32 %v1264_v17  ;;  %v1271_v30 = vadd.f32 1.0, %v3134_v19  ;;  %v2798_v19 = vmul.f32 -1.442695, %v4266_v57  ;;  %v2800_v38 = vmul.f32 -1.442695, %v4270_v15 }
 0x166   : > { %v3138_v35 = vpop.eup %3137  ;;  %3157 = vrcp.f32 %v1266_v24  ;;  %v1273_v44 = vadd.f32 1.0, %v3136_v28  ;;  %v2799_v2 = vmul.f32 -1.442695, %v4276_v4  ;;  %v2801_v43 = vmul.f32 -1.442695, %v4282_v56 }
 0x167   : > { %v3140_v46 = vpop.eup %3139  ;;  %3159 = vrcp.f32 %v1271_v30  ;;  %v1272_v40 = vadd.f32 1.0, %v3138_v35 }
 0x168   : > { %v3142_v47 = vpop.eup %3141  ;;  %3161 = vrcp.f32 %v1273_v44  ;;  %v1274_v10 = vadd.f32 1.0, %v3140_v46 }
 0x169   : > { %v3144_v53 = vpop.eup %3143  ;;  %3163 = vrcp.f32 %v1272_v40  ;;  %v1279_v60 = vadd.f32 1.0, %v3142_v47 }
 0x16a   : > { %v3146_v16 = vpop.eup %3145  ;;  %3165 = vrcp.f32 %v1274_v10  ;;  %v1281_v59 = vadd.f32 1.0, %v3144_v53 }
 0x16b   : > { %v3148_v22 = vpop.eup %3147  ;;  %3167 = vrcp.f32 %v1279_v60  ;;  %v1280_v42 = vadd.f32 1.0, %v3146_v16 }
 0x16c   : > { %v3150_v3 = vpop.eup %3149  ;;  %3169 = vrcp.f32 %v1281_v59  ;;  %v1282_v45 = vadd.f32 1.0, %v3148_v22 }
 0x16d   : > { %v3152_v27 = vpop.eup %3151  ;;  %3171 = vrcp.f32 %v1280_v42 }
 0x16e   : > { %v3154_v13 = vpop.eup %3153  ;;  %3173 = vrcp.f32 %v1282_v45  ;;  %v1289_v42 = vadd.f32 1.0, %v3152_v27 }
 0x16f   : > { %v3156_v17 = vpop.eup %3155  ;;  %v1457_v11 = vmul.f32 %v3154_v13, %v4164_v9  ;;  %3175 = vpow2.f32 %v2791_v50 }
 0x170   : > { %v3158_v58 = vpop.eup %3157  ;;  %v1456_v24 = vmul.f32 %v3156_v17, %v4169_v14  ;;  %3177 = vpow2.f32 %v2793_v5 }
 0x171   : > { %v3160_v63 = vpop.eup %3159  ;;  %v1513_v28 = vpack.c.bf16 %v1457_v11, %v1449_v7  ;;  %v1458_v30 = vmul.f32 %v3158_v58, %v4177_v32  ;;  %3179 = vpow2.f32 %v2798_v19 }
 0x172   : > { %v3162_v35 = vpop.eup %3161  ;;  %v1512_v6 = vpack.c.bf16 %v1456_v24, %v1448_v51  ;;  %v1463_v14 = vmul.f32 %v3160_v63, %v4181_v41  ;;  %3181 = vpow2.f32 %v2800_v38  ;;  %v1287_v41 = vadd.f32 1.0, %v3150_v3 }
 0x173   : > { %v3164_v9 = vpop.eup %3163  ;;  %v1514_v44 = vpack.c.bf16 %v1458_v30, %v1450_v37  ;;  %v1465_v47 = vmul.f32 %v3162_v35, %v4186_v48  ;;  %3183 = vpow2.f32 %v2799_v2 }
 0x174   : > { %v3166_v46 = vpop.eup %3165  ;;  %1618 = vmatprep.subr.bf16.mxu0 %v1512_v6  ;;  %3185 = vpow2.f32 %v2801_v43  ;;  %v1464_v59 = vmul.f32 %v3164_v9, %v4189_v49 }
 0x175   : > { %v3168_v40 = vpop.eup %3167  ;;  %1691 = vmatprep.subr.bf16.mxu1 %v1514_v44  ;;  %1619 = vmatpush1.bf16.msra.mxu0 %v1511_v34  ;;  %v1466_v23 = vmul.f32 %v3166_v46, %v4196_v54  ;;  %3187 = vrcp.f32 %v1287_v41 }
 0x176   : > { %v3170_v32 = vpop.eup %3169  ;;  %v1471_v10 = vmul.f32 %v3168_v40, %v4199_v55  ;;  %1692 = vmatpush1.bf16.msra.mxu1 %v1513_v28  ;;  %v935_v45 = vpop.f32.mrb[16].mxu0  ;;  %3189 = vrcp.f32 %v1289_v42 }
 0x177   : > { %v3172_v53 = vpop.eup %3171  ;;  %v1473_v60 = vmul.f32 %v3170_v32, %v4206_v61  ;;  %v4305_v55 = vadd.f32 %v935_v45, %v4103_v0  ;;  %v1008_v7 = vpop.f32.mrb[16].mxu1 }
 0x178   : > { %v3174_v16 = vpop.eup %3173  ;;  %v1519_v22 = vpack.c.bf16 %v1471_v10, %v1463_v14  ;;  %v1472_v48 = vmul.f32 %v3172_v53, %v4209_v62  ;;  %v937_v50 = vpop.f32.mrb[17].mxu0 }
 0x179   : > { %v1521_v12 = vpack.c.bf16 %v1473_v60, %v1465_v47  ;;  %v1474_v34 = vmul.f32 %v3174_v16, %v4225_v25  ;;  %v1010_v3 = vpop.f32.mrb[17].mxu1  ;;  %v939_v13 = vpop.f32.mrb[18].mxu0  ;;  %v2746_v62 = vmul.f32 -1.442695, %v4305_v55  ;;  %v4309_v25 = vadd.f32 %v1008_v7, %v4103_v0 }
 0x17a   : > { %v1520_v61 = vpack.c.bf16 %v1472_v48, %v1464_v59  ;;  %v3176_v51 = vpop.eup %3175  ;;  %v1012_v27 = vpop.f32.mrb[18].mxu1  ;;  %v4312_v58 = vadd.f32 %v937_v50, %v4103_v0  ;;  %v4315_v63 = vadd.f32 %v1010_v3, %v4103_v0  ;;  %v4318_v2 = vadd.f32 %v939_v13, %v4107_v39 }
 0x17b   : > { %v1522_v49 = vpack.c.bf16 %v1474_v34, %v1466_v23  ;;  %v941_v5 = vpop.f32.mrb[19].mxu0  ;;  %v3178_v17 = vpop.eup %3177  ;;  %v1288_v54 = vadd.f32 1.0, %v3176_v51  ;;  %3191 = vpow2.f32 %v2746_v62  ;;  %v2748_v6 = vmul.f32 -1.442695, %v4309_v25 }
 0x17c   : > { %1620 = vmatprep.subr.bf16.mxu0 %v1520_v61  ;;  %v1014_v37 = vpop.f32.mrb[19].mxu1  ;;  %v3180_v11 = vpop.eup %3179  ;;  %v1290_v19 = vadd.f32 1.0, %v3178_v17  ;;  %v4322_v9 = vadd.f32 %v1012_v27, %v4107_v39  ;;  %v2747_v0 = vmul.f32 -1.442695, %v4312_v58  ;;  %v4326_v14 = vadd.f32 %v941_v5, %v4107_v39 }
 0x17d   : > { %1693 = vmatprep.subr.bf16.mxu1 %v1522_v49  ;;  %1621 = vmatpush1.bf16.msra.mxu0 %v1519_v22  ;;  %v3182_v24 = vpop.eup %3181  ;;  %3193 = vrcp.f32 %v1288_v54  ;;  %v1295_v38 = vadd.f32 1.0, %v3180_v11  ;;  %v2749_v32 = vmul.f32 -1.442695, %v4315_v63  ;;  %v2754_v60 = vmul.f32 -1.442695, %v4318_v2 }
 0x17e   : > { %1694 = vmatpush1.bf16.msra.mxu1 %v1521_v12  ;;  %v3184_v28 = vpop.eup %3183  ;;  %3195 = vrcp.f32 %v1290_v19  ;;  %v1297_v30 = vadd.f32 1.0, %v3182_v24  ;;  %v945_v44 = vpop.f32.mrb[20].mxu0  ;;  %v4331_v41 = vadd.f32 %v1014_v37, %v4107_v39  ;;  %v2756_v22 = vmul.f32 -1.442695, %v4322_v9 }
 0x17f   : > { %v3186_v35 = vpop.eup %3185  ;;  %3197 = vrcp.f32 %v1295_v38  ;;  %v1296_v43 = vadd.f32 1.0, %v3184_v28  ;;  %v1018_v40 = vpop.f32.mrb[20].mxu1  ;;  %v4337_v48 = vadd.f32 %v945_v44, %v4105_v20  ;;  %v2755_v23 = vmul.f32 -1.442695, %v4326_v14 }
 0x180   : > { %3199 = vrcp.f32 %v1297_v30  ;;  %v1298_v46 = vadd.f32 1.0, %v3186_v35  ;;  %v947_v47 = vpop.f32.mrb[21].mxu0  ;;  %v1020_v10 = vpop.f32.mrb[21].mxu1  ;;  %v4343_v12 = vadd.f32 %v1018_v40, %v4105_v20  ;;  %v2757_v50 = vmul.f32 -1.442695, %v4331_v41 }
 0x181   : > { %3201 = vrcp.f32 %v1296_v43  ;;  %v949_v53 = vpop.f32.mrb[22].mxu0  ;;  %v1022_v16 = vpop.f32.mrb[22].mxu1  ;;  %v4346_v34 = vadd.f32 %v947_v47, %v4105_v20  ;;  %v4350_v61 = vadd.f32 %v1020_v10, %v4105_v20  ;;  %v2762_v51 = vmul.f32 -1.442695, %v4337_v48 }
 0x182   : > { %3203 = vrcp.f32 %v1298_v46  ;;  %v4333_v59 = vpop.f32.mrb[23].mxu0  ;;  %v4339_v42 = vpop.f32.mrb[23].mxu1  ;;  %v4354_v49 = vadd.f32 %v949_v53, %v4140_v31  ;;  %v2764_v5 = vmul.f32 -1.442695, %v4343_v12 }
 0x183   : > { %3205 = vpow2.f32 %v2748_v6  ;;  %v3188_v45 = vpop.eup %3187  ;;  %v2763_v37 = vmul.f32 -1.442695, %v4346_v34  ;;  %v2765_v30 = vmul.f32 -1.442695, %v4350_v61 }
 0x184   : > { %3207 = vpow2.f32 %v2747_v0  ;;  %v3190_v39 = vpop.eup %3189  ;;  %v1479_v38 = vmul.f32 %v3188_v45, %v4230_v36  ;;  %v2770_v0 = vmul.f32 -1.442695, %v4354_v49 }
 0x185   : > { %3209 = vpow2.f32 %v2749_v32  ;;  %v3192_v7 = vpop.eup %3191  ;;  %v1481_v44 = vmul.f32 %v3190_v39, %v4235_v52 }
 0x186   : > { %3211 = vpow2.f32 %v2754_v60  ;;  %v1243_v13 = vadd.f32 1.0, %v3192_v7  ;;  %v4356_v62 = vpop.f32.mrb[24].mxu0 }
 0x187   : > { %v3194_v3 = vpop.eup %3193  ;;  %3213 = vpow2.f32 %v2756_v22  ;;  %v4359_v17 = vpop.f32.mrb[24].mxu1 }
 0x188   : > { %v3196_v27 = vpop.eup %3195  ;;  %3215 = vpow2.f32 %v2755_v23  ;;  %v4361_v54 = vpop.f32.mrb[25].mxu0  ;;  %v4385_v23 = vadd.f32 %v1022_v16, %v4140_v31 }
 0x189   : > { %v3198_v20 = vpop.eup %3197  ;;  %3217 = vrcp.f32 %v1243_v13  ;;  %v4364_v11 = vpop.f32.mrb[25].mxu1  ;;  %v1482_v53 = vmul.f32 %v3196_v27, %v4262_v1  ;;  %v4392_v1 = vld [vmem:[%s5236_s3] sm:$0xff]  }
 0x18a   : > { %v4366_v19 = vpop.f32.mrb[26].mxu0  ;;  %v3200_v24 = vpop.eup %3199  ;;  %v1487_v28 = vmul.f32 %v3198_v20, %v4266_v57  ;;  %3219 = vpow2.f32 %v2757_v50  ;;  %v1480_v57 = vmul.f32 %v3194_v3, %v4256_v8 }
 0x18b   : > { %v4371_v35 = vpop.f32.mrb[26].mxu1  ;;  %v4373_v43 = vpop.f32.mrb[27].mxu0  ;;  %v1489_v46 = vmul.f32 %v3200_v24, %v4270_v15  ;;  %3221 = vpow2.f32 %v2762_v51  ;;  %v2772_v24 = vmul.f32 -1.442695, %v4385_v23 }
 0x18c   : > { %v3202_v6 = vpop.eup %3201  ;;  %v4378_v40 = vpop.f32.mrb[27].mxu1  ;;  %v1527_v47 = vpack.c.bf16 %v1487_v28, %v1479_v38  ;;  %3223 = vpow2.f32 %v2764_v5  ;;  %v4405_v38 = vadd.f32 %v4333_v59, %v4140_v31 }
 0x18d   : > { %v3204_v36 = vpop.eup %3203  ;;  %v1488_v32 = vmul.f32 %v3202_v6, %v4276_v4  ;;  %v1529_v60 = vpack.c.bf16 %v1489_v46, %v1481_v44  ;;  %3225 = vpow2.f32 %v2763_v37 }
 0x18e   : > { %v3206_v10 = vpop.eup %3205  ;;  %v1490_v52 = vmul.f32 %v3204_v36, %v4282_v56  ;;  %3227 = vpow2.f32 %v2765_v30  ;;  %v4387_v4 = vpop.f32.mrb[28].mxu0 }
 0x18f   : > { %v3208_v15 = vpop.eup %3207  ;;  %v1528_v22 = vpack.c.bf16 %v1488_v32, %v1480_v57  ;;  %v1245_v45 = vadd.f32 1.0, %v3206_v10  ;;  %3229 = vpow2.f32 %v2770_v0  ;;  %v4394_v3 = vpop.f32.mrb[28].mxu1  ;;  %v2771_v32 = vmul.f32 -1.442695, %v4405_v38 }
 0x190   : > { %v3210_v39 = vpop.eup %3209  ;;  %v1530_v8 = vpack.c.bf16 %v1490_v52, %v1482_v53  ;;  %v1244_v7 = vadd.f32 1.0, %v3208_v15  ;;  %v4396_v13 = vpop.f32.mrb[29].mxu0  ;;  %v4422_v10 = vadd.f32 %v4339_v42, %v4140_v31  ;;  %v4426_v52 = vadd.f32 %v4356_v62, %v4171_v21 }
 0x191   : > { %v3212_v50 = vpop.eup %3211  ;;  %1622 = vmatprep.subr.bf16.mxu0 %v1528_v22  ;;  %3231 = vrcp.f32 %v1245_v45  ;;  %v1246_v56 = vadd.f32 1.0, %v3210_v39  ;;  %v4398_v27 = vpop.f32.mrb[29].mxu1  ;;  %v4430_v15 = vadd.f32 %v4359_v17, %v4171_v21  ;;  %v4435_v45 = vld [vmem:[%s5236_s3 + $0x8] sm:$0xff]   ;;  %v4439_v42 = vadd.f32 %v4361_v54, %v4171_v21 }
 0x192   : > { %v3214_v16 = vpop.eup %3213  ;;  %1695 = vmatprep.subr.bf16.mxu1 %v1530_v8  ;;  %1623 = vmatpush1.bf16.msra.mxu0 %v1527_v47  ;;  %3233 = vrcp.f32 %v1244_v7  ;;  %v1251_v51 = vadd.f32 1.0, %v3212_v50  ;;  %v4400_v5 = vpop.f32.mrb[30].mxu0  ;;  %v4443_v62 = vadd.f32 %v4364_v11, %v4171_v21  ;;  %v4447_v8 = vadd.f32 %v4366_v19, %v4173_v26 }
 0x193   : > { %v3216_v20 = vpop.eup %3215  ;;  %1696 = vmatpush1.bf16.msra.mxu1 %v1529_v60  ;;  %3235 = vrcp.f32 %v1246_v56  ;;  %v1253_v37 = vadd.f32 1.0, %v3214_v16  ;;  %v4407_v28 = vpop.f32.mrb[30].mxu1  ;;  %v4451_v7 = vadd.f32 %v4371_v35, %v4173_v26  ;;  %v2773_v54 = vmul.f32 -1.442695, %v4422_v10 }
 0x194   : > { %v4409_v30 = vpop.f32.mrb[31].mxu0  ;;  %v3218_v6 = vpop.eup %3217  ;;  %3237 = vrcp.f32 %v1251_v51  ;;  %v1252_v44 = vadd.f32 1.0, %v3216_v20  ;;  %v2778_v21 = vmul.f32 -1.442695, %v4426_v52  ;;  %v4457_v11 = vadd.f32 %v4373_v43, %v4173_v26 }
 0x195   : > { %v4411_v46 = vpop.f32.mrb[31].mxu1  ;;  %v3220_v0 = vpop.eup %3219  ;;  %2810 = vmatmul.mubr.msk.bf16.vlgmr.msra.gmra.mrb[32].mxu0 %vm1603_vm1, %v4392_v1  ;;  %3239 = vrcp.f32 %v1253_v37  ;;  %v2780_v19 = vmul.f32 -1.442695, %v4430_v15  ;;  %v2779_v35 = vmul.f32 -1.442695, %v4439_v42 }
 0x196   : > { %v3222_v36 = vpop.eup %3221  ;;  %2814 = vmatmul.mubr.msk.bf16.vlgmr.msra.gmra.mrb[32].mxu1 %vm1603_vm1, %v4392_v1  ;;  %3241 = vrcp.f32 %v1252_v44  ;;  %v1254_v59 = vadd.f32 1.0, %v3220_v0  ;;  %1658 = vmatprep.mubr.bf16.mxu0 %v3651_v29  ;;  %v2781_v20 = vmul.f32 -1.442695, %v4443_v62  ;;  %v2786_v43 = vmul.f32 -1.442695, %v4447_v8 }
 0x197   : > { %v3224_v57 = vpop.eup %3223  ;;  %1731 = vmatprep.mubr.bf16.mxu1 %v3651_v29  ;;  %v1259_v47 = vadd.f32 1.0, %v3222_v36  ;;  %3243 = vpow2.f32 %v2772_v24  ;;  %v2788_v24 = vmul.f32 -1.442695, %v4451_v7  ;;  %v4471_v44 = vadd.f32 %v4378_v40, %v4173_v26 }
 0x198   : > { %v3226_v53 = vpop.eup %3225  ;;  %3245 = vrcp.f32 %v1254_v59  ;;  %v1261_v60 = vadd.f32 1.0, %v3224_v57  ;;  %v1435_v36 = vmul.f32 %v3218_v6, %v4305_v55  ;;  %v4478_v57 = vadd.f32 %v4387_v4, %v4219_v18  ;;  %v4488_v4 = vld [vmem:[%s5236_s3 + $0x10] sm:$0xff]  }
 0x199   : > { %v3228_v22 = vpop.eup %3227  ;;  %3247 = vrcp.f32 %v1259_v47  ;;  %v1260_v31 = vadd.f32 1.0, %v3226_v53  ;;  %v2787_v26 = vmul.f32 -1.442695, %v4457_v11 }
 0x19a   : > { %v3230_v39 = vpop.eup %3229  ;;  %3249 = vrcp.f32 %v1261_v60  ;;  %v1262_v17 = vadd.f32 1.0, %v3228_v22 }
 0x19b   : > { %v3232_v50 = vpop.eup %3231  ;;  %3251 = vrcp.f32 %v1260_v31  ;;  %v1267_v56 = vadd.f32 1.0, %v3230_v39 }
 0x19c   : > { %v3234_v16 = vpop.eup %3233  ;;  %3253 = vrcp.f32 %v1262_v17 }
 0x19d   : > { %v3236_v51 = vpop.eup %3235  ;;  %2811 = vmatmul.mubr.msk.bf16.gmra.mrb[36].mxu0 %vm1603_vm1, %v4435_v45  ;;  %3255 = vrcp.f32 %v1267_v56  ;;  %v1436_v55 = vmul.f32 %v3234_v16, %v4312_v58 }
 0x19e   : > { %v3238_v37 = vpop.eup %3237  ;;  %2815 = vmatmul.mubr.msk.bf16.gmra.mrb[36].mxu1 %vm1603_vm1, %v4435_v45  ;;  %3257 = vpow2.f32 %v2771_v32  ;;  %1668 = vmatprep.mubr.bf16.mxu0 %v3651_v29  ;;  %v1437_v32 = vmul.f32 %v3232_v50, %v4309_v25  ;;  %v1438_v58 = vmul.f32 %v3236_v51, %v4315_v63  ;;  %v2789_v50 = vmul.f32 -1.442695, %v4471_v44 }
 0x19f   : > { %v3240_v0 = vpop.eup %3239  ;;  %v1443_v59 = vmul.f32 %v3238_v37, %v4318_v2  ;;  %3259 = vpow2.f32 %v2773_v54  ;;  %1741 = vmatprep.mubr.bf16.mxu1 %v3651_v29  ;;  %v4518_v37 = vld [vmem:[%s5236_s3 + $0x18] sm:$0xff]  }
 0x1a0   : > { %v3242_v47 = vpop.eup %3241  ;;  %v1445_v53 = vmul.f32 %v3240_v0, %v4322_v9  ;;  %3261 = vpow2.f32 %v2778_v21  ;;  %v4492_v9 = vadd.f32 %v4394_v3, %v4219_v18  ;;  %v2794_v3 = vmul.f32 -1.442695, %v4478_v57 }
 0x1a1   : > { %v3244_v40 = vpop.eup %3243  ;;  %v1507_v6 = vpack.c.bf16 %v1443_v59, %v1435_v36  ;;  %v1444_v2 = vmul.f32 %v3242_v47, %v4326_v14  ;;  %3263 = vpow2.f32 %v2780_v19 }
 0x1a2   : > { %v3246_v60 = vpop.eup %3245  ;;  %v1509_v22 = vpack.c.bf16 %v1445_v53, %v1437_v32  ;;  %v1269_v25 = vadd.f32 1.0, %v3244_v40  ;;  %3265 = vpow2.f32 %v2779_v35  ;;  %v2796_v63 = vmul.f32 -1.442695, %v4492_v9 }
 0x1a3   : > { %v3248_v31 = vpop.eup %3247  ;;  %v1446_v39 = vmul.f32 %v3246_v60, %v4331_v41  ;;  %3267 = vpow2.f32 %v2781_v20  ;;  %v1508_v14 = vpack.c.bf16 %v1444_v2, %v1436_v55 }
 0x1a4   : > { %v3250_v17 = vpop.eup %3249  ;;  %3269 = vrcp.f32 %v1269_v25  ;;  %v4510_v51 = vmul.f32 %v3248_v31, %v4337_v48  ;;  %v4537_v25 = vadd.f32 %v4398_v27, %v4219_v18 }
 0x1a5   : > { %v4497_v56 = vpop.eup %3251  ;;  %2812 = vmatmul.mubr.msk.bf16.gmra.mrb[40].mxu0 %vm1603_vm1, %v4488_v4  ;;  %3271 = vpow2.f32 %v2786_v43  ;;  %1762 = vmatprep.subr.bf16.mxu0 %v1508_v14  ;;  %v1510_v54 = vpack.c.bf16 %v1446_v39, %v1438_v58  ;;  %v4522_v43 = vadd.f32 %v4396_v13, %v4219_v18  ;;  %v4541_v14 = vadd.f32 %v4400_v5, %v4258_v33 }
 0x1a6   : > { %v4502_v16 = vpop.eup %3253  ;;  %2816 = vmatmul.mubr.msk.bf16.gmra.mrb[40].mxu1 %vm1603_vm1, %v4488_v4  ;;  %3273 = vpow2.f32 %v2788_v24  ;;  %1678 = vmatprep.mubr.bf16.mxu0 %v3651_v29  ;;  %v4549_v18 = vadd.f32 %v4409_v30, %v4258_v33  ;;  %v4554_v5 = vadd.f32 %v4411_v46, %v4258_v33 }
 0x1a7   : > { %v3256_v41 = vpop.eup %3255  ;;  %3275 = vpow2.f32 %v2787_v26  ;;  %1751 = vmatprep.mubr.bf16.mxu1 %v3651_v29  ;;  %1835 = vmatprep.subr.bf16.mxu1 %v1510_v54  ;;  %v2795_v13 = vmul.f32 -1.442695, %v4522_v43  ;;  %v2797_v54 = vmul.f32 -1.442695, %v4537_v25 }
 0x1a8   : > { %v3258_v21 = vpop.eup %3257  ;;  %v4513_v19 = vmul.f32 %v3256_v41, %v4354_v49  ;;  %3277 = vpow2.f32 %v2789_v50  ;;  %1763 = vmatpush1.bf16.msra.mxu0 %v1507_v6  ;;  %1836 = vmatpush1.bf16.msra.mxu1 %v1509_v22  ;;  %v1453_v6 = vmul.f32 %v3250_v17, %v4343_v12  ;;  %v4545_v17 = vadd.f32 %v4407_v28, %v4258_v33 }
 0x1a9   : > { %v3260_v35 = vpop.eup %3259  ;;  %v1268_v20 = vadd.f32 1.0, %v3258_v21  ;;  %3279 = vpow2.f32 %v2794_v3  ;;  %v2802_v28 = vmul.f32 -1.442695, %v4541_v14  ;;  %v1452_v21 = vmul.f32 %v4497_v56, %v4346_v34 }
 0x1aa   : > { %v3262_v48 = vpop.eup %3261  ;;  %v1515_v49 = vpack.c.bf16 %v4513_v19, %v4510_v51  ;;  %v1270_v24 = vadd.f32 1.0, %v3260_v35  ;;  %3281 = vpow2.f32 %v2796_v63  ;;  %v2804_v30 = vmul.f32 -1.442695, %v4545_v17 }
 0x1ab   : > { %v3264_v0 = vpop.eup %3263  ;;  %3283 = vrcp.f32 %v1268_v20  ;;  %v1275_v36 = vadd.f32 1.0, %v3262_v48  ;;  %v1454_v48 = vmul.f32 %v4502_v16, %v4350_v61  ;;  %v2803_v33 = vmul.f32 -1.442695, %v4549_v18 }
 0x1ac   : > { %v3266_v59 = vpop.eup %3265  ;;  %3285 = vrcp.f32 %v1270_v24  ;;  %v1277_v47 = vadd.f32 1.0, %v3264_v0  ;;  %v2805_v0 = vmul.f32 -1.442695, %v4554_v5 }
 0x1ad   : > { %v3268_v32 = vpop.eup %3267  ;;  %3287 = vrcp.f32 %v1275_v36  ;;  %v1276_v53 = vadd.f32 1.0, %v3266_v59  ;;  %2813 = vmatmul.mubr.msk.bf16.gmra.mrb[44].mxu0 %vm1603_vm1, %v4518_v37 }
 0x1ae   : > { %v3270_v26 = vpop.eup %3269  ;;  %3289 = vrcp.f32 %v1277_v47  ;;  %v1278_v40 = vadd.f32 1.0, %v3268_v32  ;;  %2817 = vmatmul.mubr.msk.bf16.gmra.mrb[44].mxu1 %vm1603_vm1, %v4518_v37  ;;  %1794 = vmatprep.mubr.bf16.mxu0 %v3651_v29 }
 0x1af   : > { %v3272_v55 = vpop.eup %3271  ;;  %v1461_v2 = vmul.f32 %v3270_v26, %v4385_v23  ;;  %3291 = vrcp.f32 %v1276_v53  ;;  %1867 = vmatprep.mubr.bf16.mxu1 %v3651_v29 }
 0x1b0   : > { %v3274_v60 = vpop.eup %3273  ;;  %3293 = vrcp.f32 %v1278_v40  ;;  %v1283_v22 = vadd.f32 1.0, %v3272_v55 }
 0x1b1   : > { %v3276_v31 = vpop.eup %3275  ;;  %v1517_v58 = vpack.c.bf16 %v1461_v2, %v1453_v6  ;;  %v1285_v39 = vadd.f32 1.0, %v3274_v60  ;;  %3295 = vpow2.f32 %v2795_v13 }
 0x1b2   : > { %v3278_v12 = vpop.eup %3277  ;;  %3297 = vrcp.f32 %v1283_v22  ;;  %v1284_v23 = vadd.f32 1.0, %v3276_v31 }
 0x1b3   : > { %v3280_v50 = vpop.eup %3279  ;;  %3299 = vrcp.f32 %v1285_v39  ;;  %v1286_v3 = vadd.f32 1.0, %v3278_v12 }
 0x1b4   : > { %v3282_v27 = vpop.eup %3281  ;;  %3301 = vrcp.f32 %v1284_v23  ;;  %v1291_v26 = vadd.f32 1.0, %v3280_v50 }
 0x1b5   : > { %v3284_v63 = vpop.eup %3283  ;;  %3303 = vrcp.f32 %v1286_v3  ;;  %v1293_v19 = vadd.f32 1.0, %v3282_v27 }
 0x1b6   : > { %v3286_v41 = vpop.eup %3285  ;;  %v1460_v35 = vmul.f32 %v3284_v63, %v4405_v38  ;;  %3305 = vpow2.f32 %v2797_v54 }
 0x1b7   : > { %v3288_v20 = vpop.eup %3287  ;;  %v1462_v24 = vmul.f32 %v3286_v41, %v4422_v10  ;;  %3307 = vpow2.f32 %v2802_v28 }
 0x1b8   : > { %v3290_v46 = vpop.eup %3289  ;;  %v1516_v36 = vpack.c.bf16 %v1460_v35, %v1452_v21  ;;  %3309 = vpow2.f32 %v2804_v30  ;;  %v1467_v16 = vmul.f32 %v3288_v20, %v4426_v52 }
 0x1b9   : > { %v3292_v59 = vpop.eup %3291  ;;  %v1518_v34 = vpack.c.bf16 %v1462_v24, %v1454_v48  ;;  %3311 = vpow2.f32 %v2803_v33  ;;  %v1469_v53 = vmul.f32 %v3290_v46, %v4430_v15 }
 0x1ba   : > { %v3294_v56 = vpop.eup %3293  ;;  %1764 = vmatprep.subr.bf16.mxu0 %v1516_v36  ;;  %3313 = vpow2.f32 %v2805_v0  ;;  %v1468_v55 = vmul.f32 %v3292_v59, %v4439_v42 }
 0x1bb   : > { %v3296_v38 = vpop.eup %3295  ;;  %1837 = vmatprep.subr.bf16.mxu1 %v1518_v34  ;;  %1765 = vmatpush1.bf16.msra.mxu0 %v1515_v49  ;;  %v1470_v49 = vmul.f32 %v3294_v56, %v4443_v62  ;;  %3315 = vrcp.f32 %v1291_v26 }
 0x1bc   : > { %v3298_v61 = vpop.eup %3297  ;;  %1838 = vmatpush1.bf16.msra.mxu1 %v1517_v58  ;;  %v1292_v60 = vadd.f32 1.0, %v3296_v38  ;;  %3317 = vrcp.f32 %v1293_v19 }
 0x1bd   : > { %v3300_v10 = vpop.eup %3299  ;;  %v1475_v47 = vmul.f32 %v3298_v61, %v4447_v8 }
 0x1be   : > { %v3302_v32 = vpop.eup %3301  ;;  %v1477_v13 = vmul.f32 %v3300_v10, %v4451_v7  ;;  %3319 = vrcp.f32 %v1292_v60 }
 0x1bf   : > { %v3304_v40 = vpop.eup %3303  ;;  %v1523_v6 = vpack.c.bf16 %v1475_v47, %v1467_v16  ;;  %v1476_v51 = vmul.f32 %v3302_v32, %v4457_v11 }
 0x1c0   : > { %v1525_v2 = vpack.c.bf16 %v1477_v13, %v1469_v53  ;;  %v1478_v52 = vmul.f32 %v3304_v40, %v4471_v44  ;;  %v3306_v22 = vpop.eup %3305 }
 0x1c1   : > { %v1524_v8 = vpack.c.bf16 %v1476_v51, %v1468_v55  ;;  %v3308_v31 = vpop.eup %3307  ;;  %v1294_v7 = vadd.f32 1.0, %v3306_v22 }
 0x1c2   : > { %v1526_v15 = vpack.c.bf16 %v1478_v52, %v1470_v49  ;;  %v3310_v58 = vpop.eup %3309  ;;  %v1299_v42 = vadd.f32 1.0, %v3308_v31 }
 0x1c3   : > { %1766 = vmatprep.subr.bf16.mxu0 %v1524_v8  ;;  %v3312_v11 = vpop.eup %3311  ;;  %3321 = vrcp.f32 %v1294_v7  ;;  %v1301_v62 = vadd.f32 1.0, %v3310_v58 }
 0x1c4   : > { %1839 = vmatprep.subr.bf16.mxu1 %v1526_v15  ;;  %1767 = vmatpush1.bf16.msra.mxu0 %v1523_v6  ;;  %v3314_v39 = vpop.eup %3313  ;;  %3323 = vrcp.f32 %v1299_v42  ;;  %v1300_v44 = vadd.f32 1.0, %v3312_v11 }
 0x1c5   : > { %1840 = vmatpush1.bf16.msra.mxu1 %v1525_v2  ;;  %3325 = vrcp.f32 %v1301_v62  ;;  %v1302_v12 = vadd.f32 1.0, %v3314_v39  ;;  %v3316_v23 = vpop.eup %3315 }
 0x1c6   : > { %3327 = vrcp.f32 %v1300_v44  ;;  %v3318_v50 = vpop.eup %3317  ;;  %v1483_v28 = vmul.f32 %v3316_v23, %v4478_v57 }
 0x1c7   : > { %3329 = vrcp.f32 %v1302_v12  ;;  %v1485_v35 = vmul.f32 %v3318_v50, %v4492_v9 }
 0x1c8   : > { %v3320_v3 = vpop.eup %3319 }
 0x1c9   : > { %v1484_v48 = vmul.f32 %v3320_v3, %v4522_v43 }
 0x1cd   : > { %v3322_v27 = vpop.eup %3321 }
 0x1ce   : > { %v3324_v54 = vpop.eup %3323  ;;  %v1486_v46 = vmul.f32 %v3322_v27, %v4537_v25 }
 0x1cf   : > { %v3326_v63 = vpop.eup %3325  ;;  %v1491_v41 = vmul.f32 %v3324_v54, %v4541_v14 }
 0x1d0   : > { %v3328_v21 = vpop.eup %3327  ;;  %v1493_v30 = vmul.f32 %v3326_v63, %v4545_v17 }
 0x1d1   : > { %v3330_v20 = vpop.eup %3329  ;;  %v1531_v24 = vpack.c.bf16 %v1491_v41, %v1483_v28  ;;  %v1492_v33 = vmul.f32 %v3328_v21, %v4549_v18 }
 0x1d2   : > { %v1533_v0 = vpack.c.bf16 %v1493_v30, %v1485_v35  ;;  %v1494_v36 = vmul.f32 %v3330_v20, %v4554_v5 }
 0x1d3   : > { %v1532_v59 = vpack.c.bf16 %v1492_v33, %v1484_v48 }
 0x1d4   : > { %v1534_v57 = vpack.c.bf16 %v1494_v36, %v1486_v46 }
 0x1d5   : > { %1768 = vmatprep.subr.bf16.mxu0 %v1532_v59 }
 0x1d6   : > { %1841 = vmatprep.subr.bf16.mxu1 %v1534_v57  ;;  %1769 = vmatpush1.bf16.msra.mxu0 %v1531_v24 }
 0x1d7   : > { %1842 = vmatpush1.bf16.msra.mxu1 %v1533_v0 }
 0x1d9   : > { %2818 = vmatmul.mubr.msk.bf16.vlgmr.msra.gmra.mrb[48].mxu0 %vm1603_vm1, %v4392_v1 }
 0x1da   : > { %2822 = vmatmul.mubr.msk.bf16.vlgmr.msra.gmra.mrb[48].mxu1 %vm1603_vm1, %v4392_v1  ;;  %1804 = vmatprep.mubr.bf16.mxu0 %v3651_v29  ;;  %v4607_v1 = vpop.permute.xlu0 %1545 }
 0x1db   : > { %1877 = vmatprep.mubr.bf16.mxu1 %v3651_v29 }
 0x1de   : > { %v4641_v55 = vpop.permute.xlu0 %1555 }
 0x1e1   : > { %2819 = vmatmul.mubr.msk.bf16.gmra.mrb[52].mxu0 %vm1603_vm1, %v4435_v45 }
 0x1e2   : > { %2823 = vmatmul.mubr.msk.bf16.gmra.mrb[52].mxu1 %vm1603_vm1, %v4435_v45  ;;  %1814 = vmatprep.mubr.bf16.mxu0 %v3651_v29  ;;  %v4609_v45 = vpop.permute.xlu1 %1550  ;;  %v4667_v54 = vpop.permute.xlu0 %1565 }
 0x1e3   : > { %1887 = vmatprep.mubr.bf16.mxu1 %v3651_v29 }
 0x1e6   : > { %v4644_v51 = vpop.permute.xlu1 %1560 }
 0x1e9   : > { %2820 = vmatmul.mubr.msk.bf16.gmra.mrb[56].mxu0 %vm1603_vm1, %v4488_v4 }
 0x1ea   : > { %2824 = vmatmul.mubr.msk.bf16.gmra.mrb[56].mxu1 %vm1603_vm1, %v4488_v4  ;;  %1824 = vmatprep.mubr.bf16.mxu0 %v3651_v29 }
 0x1eb   : > { %1897 = vmatprep.mubr.bf16.mxu1 %v3651_v29 }
 0x1f1   : > { %2821 = vmatmul.mubr.msk.bf16.gmra.mrb[60].mxu0 %vm1603_vm1, %v4518_v37 }
 0x1f2   : > { %2825 = vmatmul.mubr.msk.bf16.gmra.mrb[60].mxu1 %vm1603_vm1, %v4518_v37 }
 0x268   : > { %v1650_v9 = vpop.f32.mrb[32].mxu0 }
 0x269   : > { %v4612_v43 = vadd.f32 %v1650_v9, %v4607_v1  ;;  %v1723_v25 = vpop.f32.mrb[32].mxu1  ;;  %v1652_v4 = vpop.f32.mrb[33].mxu0 }
 0x26a   : > { %v4615_v14 = vadd.f32 %v1723_v25, %v4607_v1  ;;  %v4618_v29 = vadd.f32 %v1652_v4, %v4607_v1  ;;  %v1725_v17 = vpop.f32.mrb[33].mxu1  ;;  %v1654_v18 = vpop.f32.mrb[34].mxu0 }
 0x26b   : > { %v2826_v37 = vmul.f32 -1.442695, %v4612_v43  ;;  %v4622_v5 = vadd.f32 %v1725_v17, %v4607_v1  ;;  %v4625_v34 = vadd.f32 %v1654_v18, %v4609_v45  ;;  %v1727_v56 = vpop.f32.mrb[34].mxu1  ;;  %v1656_v38 = vpop.f32.mrb[35].mxu0 }
 0x26c   : > { %v2828_v61 = vmul.f32 -1.442695, %v4615_v14  ;;  %v2827_v10 = vmul.f32 -1.442695, %v4618_v29  ;;  %v4630_v16 = vadd.f32 %v1727_v56, %v4609_v45  ;;  %v4633_v47 = vadd.f32 %v1656_v38, %v4609_v45  ;;  %v1729_v32 = vpop.f32.mrb[35].mxu1 }
 0x26d   : > { %3331 = vpow2.f32 %v2826_v37  ;;  %v2829_v53 = vmul.f32 -1.442695, %v4622_v5  ;;  %v2834_v13 = vmul.f32 -1.442695, %v4625_v34  ;;  %v4638_v26 = vadd.f32 %v1729_v32, %v4609_v45 }
 0x26e   : > { %3333 = vpow2.f32 %v2828_v61  ;;  %v2836_v40 = vmul.f32 -1.442695, %v4630_v16  ;;  %v2835_v6 = vmul.f32 -1.442695, %v4633_v47 }
 0x26f   : > { %3335 = vpow2.f32 %v2827_v10  ;;  %v2837_v19 = vmul.f32 -1.442695, %v4638_v26  ;;  %v4681_v10 = vpop.permute.xlu1 %1570 }
 0x270   : > { %3337 = vpow2.f32 %v2829_v53  ;;  %v1660_v49 = vpop.f32.mrb[36].mxu0  ;;  %5251 = vst [vmem:[#allocation6_spill] sm:$0xff] %v4681_v10 }
 0x271   : > { %3339 = vpow2.f32 %v2834_v13  ;;  %v4648_v2 = vadd.f32 %v1660_v49, %v4641_v55  ;;  %v1733_v52 = vpop.f32.mrb[36].mxu1  ;;  %v1662_v60 = vpop.f32.mrb[37].mxu0 }
 0x272   : > { %3341 = vpow2.f32 %v2836_v40  ;;  %v4651_v8 = vadd.f32 %v1733_v52, %v4641_v55  ;;  %v4654_v22 = vadd.f32 %v1662_v60, %v4641_v55  ;;  %v1735_v15 = vpop.f32.mrb[37].mxu1  ;;  %v1664_v31 = vpop.f32.mrb[38].mxu0 }
 0x273   : > { %3343 = vpow2.f32 %v2835_v6  ;;  %v2842_v7 = vmul.f32 -1.442695, %v4648_v2  ;;  %v4658_v58 = vadd.f32 %v1735_v15, %v4641_v55  ;;  %v4661_v42 = vadd.f32 %v1664_v31, %v4644_v51  ;;  %v1737_v11 = vpop.f32.mrb[38].mxu1  ;;  %v1666_v62 = vpop.f32.mrb[39].mxu0 }
 0x274   : > { %3345 = vpow2.f32 %v2837_v19  ;;  %v2844_v39 = vmul.f32 -1.442695, %v4651_v8  ;;  %v2843_v44 = vmul.f32 -1.442695, %v4654_v22  ;;  %v1739_v12 = vpop.f32.mrb[39].mxu1  ;;  %v4670_v36 = vadd.f32 %v1737_v11, %v4644_v51  ;;  %v4687_v49 = vpop.permute.xlu0 %1575 }
 0x275   : > { %3347 = vpow2.f32 %v2842_v7  ;;  %v2845_v23 = vmul.f32 -1.442695, %v4658_v58  ;;  %v2850_v50 = vmul.f32 -1.442695, %v4661_v42  ;;  %v4673_v4 = vadd.f32 %v1666_v62, %v4644_v51 }
 0x276   : > { %3349 = vpow2.f32 %v2844_v39  ;;  %v4676_v17 = vadd.f32 %v1739_v12, %v4644_v51  ;;  %v2852_v6 = vmul.f32 -1.442695, %v4670_v36 }
 0x277   : > { %v3332_v3 = vpop.eup %3331  ;;  %3351 = vpow2.f32 %v2843_v44  ;;  %v2851_v60 = vmul.f32 -1.442695, %v4673_v4 }
 0x278   : > { %v3334_v27 = vpop.eup %3333  ;;  %v2100_v63 = vadd.f32 1.0, %v3332_v3  ;;  %3353 = vpow2.f32 %v2845_v23  ;;  %v1670_v28 = vpop.f32.mrb[40].mxu0  ;;  %v2853_v15 = vmul.f32 -1.442695, %v4676_v17 }
 0x279   : > { %v3336_v41 = vpop.eup %3335  ;;  %v2102_v21 = vadd.f32 1.0, %v3334_v27  ;;  %3355 = vpow2.f32 %v2850_v50  ;;  %v1743_v35 = vpop.f32.mrb[40].mxu1  ;;  %v4679_v38 = vadd.f32 %v1670_v28, %v4667_v54 }
 0x27a   : > { %v1672_v30 = vpop.f32.mrb[41].mxu0  ;;  %v3338_v20 = vpop.eup %3337  ;;  %3357 = vrcp.f32 %v2100_v63  ;;  %v2101_v48 = vadd.f32 1.0, %v3336_v41  ;;  %v4684_v53 = vadd.f32 %v1743_v35, %v4667_v54 }
 0x27b   : > { %v1745_v24 = vpop.f32.mrb[41].mxu1  ;;  %v1674_v33 = vpop.f32.mrb[42].mxu0  ;;  %3359 = vrcp.f32 %v2102_v21  ;;  %v2103_v0 = vadd.f32 1.0, %v3338_v20  ;;  %v2858_v62 = vmul.f32 -1.442695, %v4679_v38  ;;  %v4693_v39 = vadd.f32 %v1672_v30, %v4667_v54 }
 0x27c   : > { %v3340_v46 = vpop.eup %3339  ;;  %v1747_v59 = vpop.f32.mrb[42].mxu1  ;;  %3361 = vrcp.f32 %v2101_v48  ;;  %v2860_v3 = vmul.f32 -1.442695, %v4684_v53  ;;  %v4699_v27 = vadd.f32 %v1745_v24, %v4667_v54  ;;  %v4706_v35 = vadd.f32 %v1674_v33, %v4681_v10 }
 0x27d   : > { %v1676_v57 = vpop.f32.mrb[43].mxu0  ;;  %v3342_v9 = vpop.eup %3341  ;;  %v2108_v25 = vadd.f32 1.0, %v3340_v46  ;;  %3363 = vrcp.f32 %v2103_v0  ;;  %v4709_v30 = vadd.f32 %v1747_v59, %v4681_v10  ;;  %v2859_v59 = vmul.f32 -1.442695, %v4693_v39 }
 0x27e   : > { %v1749_v18 = vpop.f32.mrb[43].mxu1  ;;  %v3344_v37 = vpop.eup %3343  ;;  %v2110_v56 = vadd.f32 1.0, %v3342_v9  ;;  %v4718_v9 = vadd.f32 %v1676_v57, %v4681_v10 }
 0x27f   : > { %v3346_v61 = vpop.eup %3345  ;;  %3365 = vrcp.f32 %v2108_v25  ;;  %v2109_v32 = vadd.f32 1.0, %v3344_v37  ;;  %v4715_v24 = vpop.permute.xlu1 %1580  ;;  %v4721_v25 = vadd.f32 %v1749_v18, %v4681_v10  ;;  %v2861_v18 = vmul.f32 -1.442695, %v4699_v27 }
 0x280   : > { %v3348_v13 = vpop.eup %3347  ;;  %3367 = vrcp.f32 %v2110_v56  ;;  %v2111_v40 = vadd.f32 1.0, %v3346_v61  ;;  %v1680_v31 = vpop.f32.mrb[44].mxu0 }
 0x281   : > { %v3350_v19 = vpop.eup %3349  ;;  %3369 = vrcp.f32 %v2109_v32  ;;  %v2116_v52 = vadd.f32 1.0, %v3348_v13  ;;  %v1753_v44 = vpop.f32.mrb[44].mxu1  ;;  %v4727_v56 = vadd.f32 %v1680_v31, %v4687_v49  ;;  %v2868_v31 = vmul.f32 -1.442695, %v4709_v30 }
 0x282   : > { %v3352_v7 = vpop.eup %3351  ;;  %3371 = vrcp.f32 %v2111_v40  ;;  %v2118_v11 = vadd.f32 1.0, %v3350_v19  ;;  %v4695_v12 = vpop.f32.mrb[45].mxu0  ;;  %v4730_v61 = vadd.f32 %v1753_v44, %v4687_v49 }
 0x283   : > { %v3354_v23 = vpop.eup %3353  ;;  %3373 = vrcp.f32 %v2116_v52  ;;  %v2117_v50 = vadd.f32 1.0, %v3352_v7  ;;  %v4701_v63 = vpop.f32.mrb[45].mxu1  ;;  %v2866_v52 = vmul.f32 -1.442695, %v4706_v35 }
 0x284   : > { %v4703_v28 = vpop.f32.mrb[46].mxu0  ;;  %v3356_v41 = vpop.eup %3355  ;;  %3375 = vrcp.f32 %v2118_v11  ;;  %v2119_v21 = vadd.f32 1.0, %v3354_v23 }
 0x285   : > { %v4711_v20 = vpop.f32.mrb[46].mxu1  ;;  %v4713_v48 = vpop.f32.mrb[47].mxu0  ;;  %3377 = vrcp.f32 %v2117_v50  ;;  %v2124_v0 = vadd.f32 1.0, %v3356_v41 }
 0x286   : > { %v3358_v46 = vpop.eup %3357  ;;  %v4723_v33 = vpop.f32.mrb[47].mxu1  ;;  %3379 = vrcp.f32 %v2119_v21 }
 0x287   : > { %v3360_v37 = vpop.eup %3359  ;;  %v2292_v13 = vmul.f32 %v3358_v46, %v4612_v43  ;;  %3381 = vrcp.f32 %v2124_v0  ;;  %v4738_v11 = vpop.permute.xlu0 %2366  ;;  %v2867_v43 = vmul.f32 -1.442695, %v4718_v9 }
 0x288   : > { %v3362_v32 = vpop.eup %3361  ;;  %v2294_v57 = vmul.f32 %v3360_v37, %v4615_v14  ;;  %3383 = vpow2.f32 %v2852_v6  ;;  %v2869_v14 = vmul.f32 -1.442695, %v4721_v25  ;;  %v2876_v6 = vmul.f32 -1.442695, %v4730_v61  ;;  %v4746_v21 = vpop.permute.xlu1 %2371 }
 0x289   : > { %v3364_v40 = vpop.eup %3363  ;;  %v2293_v19 = vmul.f32 %v3362_v32, %v4618_v29  ;;  %3385 = vpow2.f32 %v2851_v60  ;;  %v2874_v29 = vmul.f32 -1.442695, %v4727_v56  ;;  %v2404_v46 = vmul.f32 %v4738_v11, %v2292_v13 }
 0x28a   : > { %v3366_v7 = vpop.eup %3365  ;;  %v2295_v44 = vmul.f32 %v3364_v40, %v4622_v5  ;;  %3387 = vpow2.f32 %v2853_v15  ;;  %v2406_v5 = vmul.f32 %v4738_v11, %v2294_v57 }
 0x28b   : > { %v3368_v23 = vpop.eup %3367  ;;  %v2300_v50 = vmul.f32 %v3366_v7, %v4625_v34  ;;  %3389 = vpow2.f32 %v2858_v62  ;;  %v2405_v37 = vmul.f32 %v4738_v11, %v2293_v19 }
 0x28c   : > { %v3370_v41 = vpop.eup %3369  ;;  %v2302_v60 = vmul.f32 %v3368_v23, %v4630_v16  ;;  %3391 = vpow2.f32 %v2860_v3  ;;  %v2407_v40 = vmul.f32 %v4738_v11, %v2295_v44  ;;  %v4759_v23 = vpop.permute.xlu0 %2376 }
 0x28d   : > { %v3372_v0 = vpop.eup %3371  ;;  %v2412_v34 = vmul.f32 %v4746_v21, %v2300_v50  ;;  %v2301_v15 = vmul.f32 %v3370_v41, %v4633_v47  ;;  %3393 = vpow2.f32 %v2859_v59 }
 0x28e   : > { %v3374_v32 = vpop.eup %3373  ;;  %v2414_v7 = vmul.f32 %v4746_v21, %v2302_v60  ;;  %v2303_v13 = vmul.f32 %v3372_v0, %v4638_v26  ;;  %3395 = vpow2.f32 %v2861_v18 }
 0x28f   : > { %v3376_v57 = vpop.eup %3375  ;;  %v2468_v10 = vadd.f32 %v2412_v34, %v2404_v46  ;;  %v2413_v16 = vmul.f32 %v4746_v21, %v2301_v15  ;;  %v2308_v62 = vmul.f32 %v3374_v32, %v4648_v2  ;;  %3397 = vpow2.f32 %v2866_v52 }
 0x290   : > { %v3378_v19 = vpop.eup %3377  ;;  %v2494_v47 = vadd.f32 %v2414_v7, %v2406_v5  ;;  %v2415_v3 = vmul.f32 %v4746_v21, %v2303_v13  ;;  %v2310_v44 = vmul.f32 %v3376_v57, %v4651_v8  ;;  %3399 = vpow2.f32 %v2868_v31 }
 0x291   : > { %v3380_v50 = vpop.eup %3379  ;;  %v2481_v41 = vadd.f32 %v2413_v16, %v2405_v37  ;;  %v2420_v26 = vmul.f32 %v4759_v23, %v2308_v62  ;;  %v2309_v59 = vmul.f32 %v3378_v19, %v4654_v22  ;;  %3401 = vpow2.f32 %v2867_v43  ;;  %v4769_v37 = vpop.permute.xlu1 %2381 }
 0x292   : > { %v3382_v46 = vpop.eup %3381  ;;  %v2507_v60 = vadd.f32 %v2415_v3, %v2407_v40  ;;  %v2422_v2 = vmul.f32 %v4759_v23, %v2310_v44  ;;  %v2311_v18 = vmul.f32 %v3380_v50, %v4658_v58  ;;  %3403 = vpow2.f32 %v2869_v14 }
 0x293   : > { %v3384_v5 = vpop.eup %3383  ;;  %v2469_v0 = vadd.f32 %v2468_v10, %v2420_v26  ;;  %v2421_v34 = vmul.f32 %v4759_v23, %v2309_v59  ;;  %v2316_v8 = vmul.f32 %v3382_v46, %v4661_v42  ;;  %3405 = vpow2.f32 %v2874_v29 }
 0x294   : > { %v3386_v52 = vpop.eup %3385  ;;  %v4771_v15 = vadd.f32 %v2494_v47, %v2422_v2  ;;  %v2423_v22 = vmul.f32 %v4759_v23, %v2311_v18  ;;  %v2126_v31 = vadd.f32 1.0, %v3384_v5  ;;  %3407 = vpow2.f32 %v2876_v6 }
 0x295   : > { %v3388_v32 = vpop.eup %3387  ;;  %v4774_v40 = vadd.f32 %v2481_v41, %v2421_v34  ;;  %v2428_v58 = vmul.f32 %v4769_v37, %v2316_v8  ;;  %v2125_v10 = vadd.f32 1.0, %v3386_v52  ;;  %v4783_v50 = vadd.f32 %v4695_v12, %v4687_v49 }
 0x296   : > { %v3390_v43 = vpop.eup %3389  ;;  %v4777_v7 = vadd.f32 %v2507_v60, %v2423_v22  ;;  %3409 = vrcp.f32 %v2126_v31  ;;  %v2127_v42 = vadd.f32 1.0, %v3388_v32  ;;  %v4787_v59 = vadd.f32 %v4701_v63, %v4687_v49 }
 0x297   : > { %v3392_v14 = vpop.eup %3391  ;;  %v4779_v13 = vadd.f32 %v2469_v0, %v2428_v58  ;;  %3411 = vrcp.f32 %v2125_v10  ;;  %v2132_v57 = vadd.f32 1.0, %v3390_v43  ;;  %v4791_v2 = vadd.f32 %v4703_v28, %v4715_v24 }
 0x298   : > { %v3394_v16 = vpop.eup %3393  ;;  %3413 = vrcp.f32 %v2127_v42  ;;  %v2134_v29 = vadd.f32 1.0, %v3392_v14  ;;  %v4795_v12 = vadd.f32 %v4711_v20, %v4715_v24  ;;  %v2875_v63 = vmul.f32 -1.442695, %v4783_v50 }
 0x299   : > { %v3396_v62 = vpop.eup %3395  ;;  %3415 = vrcp.f32 %v2132_v57  ;;  %v2133_v19 = vadd.f32 1.0, %v3394_v16  ;;  %v4800_v8 = vadd.f32 %v4713_v48, %v4715_v24  ;;  %v2877_v22 = vmul.f32 -1.442695, %v4787_v59 }
 0x29a   : > { %v3398_v47 = vpop.eup %3397  ;;  %3417 = vrcp.f32 %v2134_v29  ;;  %v2135_v3 = vadd.f32 1.0, %v3396_v62  ;;  %v4805_v31 = vadd.f32 %v4723_v33, %v4715_v24  ;;  %v2882_v58 = vmul.f32 -1.442695, %v4791_v2 }
 0x29b   : > { %v3400_v6 = vpop.eup %3399  ;;  %3419 = vrcp.f32 %v2133_v19  ;;  %v2140_v44 = vadd.f32 1.0, %v3398_v47  ;;  %v2884_v48 = vmul.f32 -1.442695, %v4795_v12  ;;  %v2883_v33 = vmul.f32 -1.442695, %v4800_v8  ;;  %v4817_v19 = vpop.permute.xlu0 %2386 }
 0x29c   : > { %v3402_v41 = vpop.eup %3401  ;;  %3421 = vrcp.f32 %v2135_v3  ;;  %v2142_v26 = vadd.f32 1.0, %v3400_v6  ;;  %v2885_v62 = vmul.f32 -1.442695, %v4805_v31 }
 0x29d   : > { %v3404_v46 = vpop.eup %3403  ;;  %3423 = vrcp.f32 %v2140_v44  ;;  %v2141_v60 = vadd.f32 1.0, %v3402_v41 }
 0x29e   : > { %v3406_v18 = vpop.eup %3405  ;;  %3425 = vrcp.f32 %v2142_v26  ;;  %v2143_v5 = vadd.f32 1.0, %v3404_v46 }
 0x29f   : > { %v3408_v0 = vpop.eup %3407  ;;  %3427 = vrcp.f32 %v2141_v60  ;;  %v2148_v34 = vadd.f32 1.0, %v3406_v18 }
 0x2a0   : > { %v3410_v52 = vpop.eup %3409  ;;  %3429 = vrcp.f32 %v2143_v5  ;;  %v2150_v28 = vadd.f32 1.0, %v3408_v0 }
 0x2a1   : > { %v3412_v20 = vpop.eup %3411  ;;  %v2318_v32 = vmul.f32 %v3410_v52, %v4670_v36  ;;  %3431 = vrcp.f32 %v2148_v34  ;;  %v4831_v34 = vpop.permute.xlu1 %2391 }
 0x2a2   : > { %v3414_v10 = vpop.eup %3413  ;;  %v2317_v43 = vmul.f32 %v3412_v20, %v4673_v4  ;;  %3433 = vrcp.f32 %v2150_v28  ;;  %5252 = vst [vmem:[#allocation7_spill] sm:$0xff] %v4831_v34 }
 0x2a3   : > { %v3416_v42 = vpop.eup %3415  ;;  %v2430_v14 = vmul.f32 %v4769_v37, %v2318_v32  ;;  %v2319_v57 = vmul.f32 %v3414_v10, %v4676_v17  ;;  %3435 = vpow2.f32 %v2875_v63 }
 0x2a4   : > { %v3418_v16 = vpop.eup %3417  ;;  %v2429_v36 = vmul.f32 %v4769_v37, %v2317_v43  ;;  %v2324_v29 = vmul.f32 %v3416_v42, %v4679_v38  ;;  %3437 = vpow2.f32 %v2877_v22 }
 0x2a5   : > { %v3420_v4 = vpop.eup %3419  ;;  %v2496_v47 = vadd.f32 %v4771_v15, %v2430_v14  ;;  %v2431_v3 = vmul.f32 %v4769_v37, %v2319_v57  ;;  %v2326_v17 = vmul.f32 %v3418_v16, %v4684_v53  ;;  %3439 = vpow2.f32 %v2882_v58 }
 0x2a6   : > { %v3422_v6 = vpop.eup %3421  ;;  %v2483_v44 = vadd.f32 %v4774_v40, %v2429_v36  ;;  %v2436_v41 = vmul.f32 %v4817_v19, %v2324_v29  ;;  %v2325_v38 = vmul.f32 %v3420_v4, %v4693_v39  ;;  %3441 = vpow2.f32 %v2884_v48 }
 0x2a7   : > { %v3424_v26 = vpop.eup %3423  ;;  %v2509_v46 = vadd.f32 %v4777_v7, %v2431_v3  ;;  %v2438_v60 = vmul.f32 %v4817_v19, %v2326_v17  ;;  %v2327_v15 = vmul.f32 %v3422_v6, %v4699_v27  ;;  %3443 = vpow2.f32 %v2883_v33 }
 0x2a8   : > { %v3426_v18 = vpop.eup %3425  ;;  %v2471_v53 = vadd.f32 %v4779_v13, %v2436_v41  ;;  %v2437_v5 = vmul.f32 %v4817_v19, %v2325_v38  ;;  %v2332_v40 = vmul.f32 %v3424_v26, %v4706_v35  ;;  %3445 = vpow2.f32 %v2885_v62 }
 0x2a9   : > { %v3428_v0 = vpop.eup %3427  ;;  %v2497_v39 = vadd.f32 %v2496_v47, %v2438_v60  ;;  %v2439_v63 = vmul.f32 %v4817_v19, %v2327_v15  ;;  %v2334_v7 = vmul.f32 %v3426_v18, %v4709_v30  ;;  %v4841_v30 = vpop.permute.xlu0 %2396 }
 0x2aa   : > { %v3430_v52 = vpop.eup %3429  ;;  %v2484_v28 = vadd.f32 %v2483_v44, %v2437_v5  ;;  %v2444_v27 = vmul.f32 %v4831_v34, %v2332_v40  ;;  %v2333_v22 = vmul.f32 %v3428_v0, %v4718_v9  ;;  %5253 = vst [vmem:[#allocation8_spill] sm:$0xff] %v4841_v30 }
 0x2ab   : > { %v3432_v13 = vpop.eup %3431  ;;  %v2510_v20 = vadd.f32 %v2509_v46, %v2439_v63  ;;  %v2446_v32 = vmul.f32 %v4831_v34, %v2334_v7  ;;  %v2335_v35 = vmul.f32 %v3430_v52, %v4721_v25 }
 0x2ac   : > { %v3434_v58 = vpop.eup %3433  ;;  %v2472_v10 = vadd.f32 %v2471_v53, %v2444_v27  ;;  %v2445_v43 = vmul.f32 %v4831_v34, %v2333_v22  ;;  %v2340_v48 = vmul.f32 %v3432_v13, %v4727_v56  ;;  %v1796_v6 = vpop.f32.mrb[48].mxu0 }
 0x2ad   : > { %v3436_v42 = vpop.eup %3435  ;;  %v2498_v14 = vadd.f32 %v2497_v39, %v2446_v32  ;;  %v2447_v57 = vmul.f32 %v4831_v34, %v2335_v35  ;;  %v2342_v9 = vmul.f32 %v3434_v58, %v4730_v61  ;;  %v4856_v38 = vadd.f32 %v1796_v6, %v4607_v1  ;;  %v1869_v26 = vpop.f32.mrb[48].mxu1 }
 0x2ae   : > { %v3438_v33 = vpop.eup %3437  ;;  %v4845_v16 = vadd.f32 %v2484_v28, %v2445_v43  ;;  %v2452_v36 = vmul.f32 %v4841_v30, %v2340_v48  ;;  %v2149_v25 = vadd.f32 1.0, %v3436_v42  ;;  %v1798_v46 = vpop.f32.mrb[49].mxu0  ;;  %v4859_v18 = vadd.f32 %v1869_v26, %v4607_v1 }
 0x2af   : > { %v3440_v29 = vpop.eup %3439  ;;  %v4848_v62 = vadd.f32 %v2510_v20, %v2447_v57  ;;  %v2454_v4 = vmul.f32 %v4841_v30, %v2342_v9  ;;  %v2151_v56 = vadd.f32 1.0, %v3438_v33  ;;  %v4862_v53 = vadd.f32 %v1798_v46, %v4607_v1  ;;  %v1871_v5 = vpop.f32.mrb[49].mxu1 }
 0x2b0   : > { %v3442_v47 = vpop.eup %3441  ;;  %v4851_v3 = vadd.f32 %v2472_v10, %v2452_v36  ;;  %3447 = vrcp.f32 %v2149_v25  ;;  %v2156_v17 = vadd.f32 1.0, %v3440_v29  ;;  %v1800_v40 = vpop.f32.mrb[50].mxu0  ;;  %v2830_v39 = vmul.f32 -1.442695, %v4856_v38 }
 0x2b1   : > { %v3444_v44 = vpop.eup %3443  ;;  %v4853_v61 = vadd.f32 %v2498_v14, %v2454_v4  ;;  %3449 = vrcp.f32 %v2151_v56  ;;  %v2158_v41 = vadd.f32 1.0, %v3442_v47  ;;  %v4866_v63 = vadd.f32 %v1871_v5, %v4607_v1  ;;  %v1873_v7 = vpop.f32.mrb[50].mxu1 }
 0x2b2   : > { %v3446_v60 = vpop.eup %3445  ;;  %3451 = vrcp.f32 %v2156_v17  ;;  %v2157_v15 = vadd.f32 1.0, %v3444_v44  ;;  %v1802_v52 = vpop.f32.mrb[51].mxu0  ;;  %v2832_v28 = vmul.f32 -1.442695, %v4859_v18  ;;  %v2831_v27 = vmul.f32 -1.442695, %v4862_v53 }
 0x2b3   : > { %3453 = vrcp.f32 %v2158_v41  ;;  %v2159_v0 = vadd.f32 1.0, %v3446_v60  ;;  %v4871_v22 = vadd.f32 %v1800_v40, %v4609_v45  ;;  %v1875_v13 = vpop.f32.mrb[51].mxu1  ;;  %v2833_v20 = vmul.f32 -1.442695, %v4866_v63 }
 0x2b4   : > { %3455 = vrcp.f32 %v2157_v15  ;;  %v4875_v32 = vadd.f32 %v1873_v7, %v4609_v45  ;;  %v4878_v1 = vadd.f32 %v1802_v52, %v4609_v45  ;;  %v4882_v58 = vadd.f32 %v1875_v13, %v4609_v45  ;;  %v1806_v48 = vpop.f32.mrb[52].mxu0 }
 0x2b5   : > { %3457 = vrcp.f32 %v2159_v0  ;;  %v2838_v35 = vmul.f32 -1.442695, %v4871_v22  ;;  %v4888_v14 = vadd.f32 %v1806_v48, %v4641_v55  ;;  %v1879_v57 = vpop.f32.mrb[52].mxu1  ;;  %v1808_v9 = vpop.f32.mrb[53].mxu0 }
 0x2b6   : > { %3459 = vpow2.f32 %v2830_v39  ;;  %v2840_v10 = vmul.f32 -1.442695, %v4875_v32  ;;  %v2839_v43 = vmul.f32 -1.442695, %v4878_v1  ;;  %v2841_v42 = vmul.f32 -1.442695, %v4882_v58  ;;  %v4913_v39 = vpop.permute.xlu1 %2401 }
 0x2b7   : > { %3461 = vpow2.f32 %v2832_v28  ;;  %v4891_v45 = vadd.f32 %v1879_v57, %v4641_v55  ;;  %v4894_v36 = vadd.f32 %v1808_v9, %v4641_v55  ;;  %v1881_v25 = vpop.f32.mrb[53].mxu1  ;;  %v1810_v29 = vpop.f32.mrb[54].mxu0  ;;  %v2846_v47 = vmul.f32 -1.442695, %v4888_v14  ;;  %5254 = vst [vmem:[#allocation9_spill] sm:$0xff] %v4913_v39 }
 0x2b8   : > { %3463 = vpow2.f32 %v2831_v27  ;;  %v4899_v17 = vadd.f32 %v1881_v25, %v4641_v55  ;;  %v4901_v6 = vpop.f32.mrb[54].mxu1  ;;  %v4903_v44 = vpop.f32.mrb[55].mxu0  ;;  %v4934_v25 = vadd.f32 %v1810_v29, %v4644_v51 }
 0x2b9   : > { %3465 = vpow2.f32 %v2833_v20  ;;  %v2848_v46 = vmul.f32 -1.442695, %v4891_v45  ;;  %v2847_v60 = vmul.f32 -1.442695, %v4894_v36  ;;  %v4908_v15 = vpop.f32.mrb[55].mxu1 }
 0x2ba   : > { %v3448_v33 = vpop.eup %3447  ;;  %3467 = vpow2.f32 %v2838_v35  ;;  %v2849_v40 = vmul.f32 -1.442695, %v4899_v17 }
 0x2bb   : > { %v3450_v4 = vpop.eup %3449  ;;  %v2341_v56 = vmul.f32 %v3448_v33, %v4783_v50  ;;  %3469 = vpow2.f32 %v2840_v10 }
 0x2bc   : > { %v3452_v41 = vpop.eup %3451  ;;  %v2343_v26 = vmul.f32 %v3450_v4, %v4787_v59  ;;  %3471 = vpow2.f32 %v2839_v43  ;;  %v4923_v43 = vpop.f32.mrb[56].mxu0 }
 0x2bd   : > { %v3454_v50 = vpop.eup %3453  ;;  %v2453_v5 = vmul.f32 %v4841_v30, %v2341_v56  ;;  %v2348_v55 = vmul.f32 %v3452_v41, %v4791_v2  ;;  %3473 = vpow2.f32 %v2841_v42  ;;  %v4927_v57 = vpop.f32.mrb[56].mxu1 }
 0x2be   : > { %v3456_v0 = vpop.eup %3455  ;;  %v2455_v59 = vmul.f32 %v4841_v30, %v2343_v26  ;;  %v2350_v7 = vmul.f32 %v3454_v50, %v4795_v12  ;;  %3475 = vpow2.f32 %v2846_v47  ;;  %v4936_v4 = vpop.f32.mrb[57].mxu1 }
 0x2bf   : > { %v3458_v52 = vpop.eup %3457  ;;  %v2486_v28 = vadd.f32 %v4845_v16, %v2453_v5  ;;  %v2460_v27 = vmul.f32 %v4913_v39, %v2348_v55  ;;  %v2349_v13 = vmul.f32 %v3456_v0, %v4800_v8  ;;  %3477 = vpow2.f32 %v2848_v46  ;;  %v4929_v8 = vpop.f32.mrb[57].mxu0 }
 0x2c0   : > { %v3460_v2 = vpop.eup %3459  ;;  %v2512_v20 = vadd.f32 %v4848_v62, %v2455_v59  ;;  %v2462_v35 = vmul.f32 %v4913_v39, %v2350_v7  ;;  %v2351_v10 = vmul.f32 %v3458_v52, %v4805_v31  ;;  %3479 = vpow2.f32 %v2847_v60  ;;  %v4940_v46 = vpop.f32.mrb[58].mxu1 }
 0x2c1   : > { %v3462_v12 = vpop.eup %3461  ;;  %v2474_v48 = vadd.f32 %v4851_v3, %v2460_v27  ;;  %v2461_v16 = vmul.f32 %v4913_v39, %v2349_v13  ;;  %v2104_v42 = vadd.f32 1.0, %v3460_v2  ;;  %3481 = vpow2.f32 %v2849_v40  ;;  %v4938_v3 = vpop.f32.mrb[58].mxu0 }
 0x2c2   : > { %v3464_v9 = vpop.eup %3463  ;;  %v2500_v62 = vadd.f32 %v4853_v61, %v2462_v35  ;;  %v2463_v33 = vmul.f32 %v4913_v39, %v2351_v10  ;;  %v2106_v31 = vadd.f32 1.0, %v3462_v12  ;;  %v4942_v60 = vpop.f32.mrb[59].mxu0 }
 0x2c3   : > { %v3466_v56 = vpop.eup %3465  ;;  %v2475_v47 = vrot.slane %v2474_v48, 4  ;;  %v2487_v41 = vadd.f32 %v2486_v28, %v2461_v16  ;;  %3483 = vrcp.f32 %v2104_v42  ;;  %v2105_v26 = vadd.f32 1.0, %v3464_v9  ;;  %v4944_v29 = vpop.f32.mrb[59].mxu1 }
 0x2c4   : > { %v3468_v61 = vpop.eup %3467  ;;  %v2501_v50 = vrot.slane %v2500_v62, 4  ;;  %v2513_v5 = vadd.f32 %v2512_v20, %v2463_v33  ;;  %3485 = vrcp.f32 %v2106_v31  ;;  %v2107_v55 = vadd.f32 1.0, %v3466_v56  ;;  %v4948_v9 = vpop.f32.mrb[60].mxu0 }
 0x2c5   : > { %v3470_v40 = vpop.eup %3469  ;;  %v2476_v0 = vadd.f32 %v2475_v47, %v2474_v48  ;;  %v2488_v59 = vrot.slane %v2487_v41, 4  ;;  %3487 = vrcp.f32 %v2105_v26  ;;  %v2112_v7 = vadd.f32 1.0, %v3468_v61  ;;  %v4950_v47 = vpop.f32.mrb[60].mxu1 }
 0x2c6   : > { %v3472_v52 = vpop.eup %3471  ;;  %v2502_v28 = vadd.f32 %v2501_v50, %v2500_v62  ;;  %v2514_v27 = vrot.slane %v2513_v5, 4  ;;  %3489 = vrcp.f32 %v2107_v55  ;;  %v2114_v13 = vadd.f32 1.0, %v3470_v40  ;;  %v4952_v26 = vpop.f32.mrb[61].mxu0 }
 0x2c7   : > { %v3474_v2 = vpop.eup %3473  ;;  %v2477_v35 = vrot.slane %v2476_v0, 2  ;;  %v2489_v10 = vadd.f32 %v2488_v59, %v2487_v41  ;;  %3491 = vrcp.f32 %v2112_v7  ;;  %v2113_v20 = vadd.f32 1.0, %v3472_v52  ;;  %v4957_v40 = vpop.f32.mrb[62].mxu0 }
 0x2c8   : > { %v3476_v12 = vpop.eup %3475  ;;  %v2503_v16 = vrot.slane %v2502_v28, 2  ;;  %v2515_v42 = vadd.f32 %v2514_v27, %v2513_v5  ;;  %3493 = vrcp.f32 %v2114_v13  ;;  %v2115_v48 = vadd.f32 1.0, %v3474_v2  ;;  %v4955_v5 = vpop.f32.mrb[61].mxu1 }
 0x2c9   : > { %v3478_v33 = vpop.eup %3477  ;;  %v2478_v31 = vadd.f32 %v2477_v35, %v2476_v0  ;;  %v2490_v56 = vrot.slane %v2489_v10, 2  ;;  %3495 = vrcp.f32 %v2113_v20  ;;  %v2120_v62 = vadd.f32 1.0, %v3476_v12  ;;  %v4961_v27 = vpop.f32.mrb[62].mxu1 }
 0x2ca   : > { %v3480_v61 = vpop.eup %3479  ;;  %v2516_v41 = vrot.slane %v2515_v42, 2  ;;  %3497 = vrcp.f32 %v2115_v48  ;;  %v2122_v50 = vadd.f32 1.0, %v3478_v33  ;;  %v2854_v55 = vmul.f32 -1.442695, %v4934_v25  ;;  %v4963_v13 = vpop.f32.mrb[63].mxu0 }
 0x2cb   : > { %v3482_v59 = vpop.eup %3481  ;;  %v4959_v7 = vadd.f32 %v2503_v16, %v2502_v28  ;;  %v2491_v0 = vadd.f32 %v2490_v56, %v2489_v10  ;;  %3499 = vrcp.f32 %v2120_v62  ;;  %v2121_v52 = vadd.f32 1.0, %v3480_v61  ;;  %v4967_v12 = vpop.f32.mrb[63].mxu1 }
 0x2cc   : > { %v2479_v2 = vrot.slane %v2478_v31, 1  ;;  %v4965_v35 = vadd.f32 %v2516_v41, %v2515_v42  ;;  %3501 = vrcp.f32 %v2122_v50  ;;  %v2123_v20 = vadd.f32 1.0, %v3482_v59 }
 0x2cd   : > { %v3484_v48 = vpop.eup %3483  ;;  %v2492_v33 = vrot.slane %v2491_v0, 1  ;;  %3503 = vrcp.f32 %v2121_v52  ;;  %v4971_v28 = vadd.f32 %v4901_v6, %v4644_v51  ;;  %v4974_v16 = vstv %s4946_s30 }
 0x2ce   : > { %v3486_v10 = vpop.eup %3485  ;;  %v2296_v56 = vmul.f32 %v3484_v48, %v4856_v38  ;;  %3505 = vrcp.f32 %v2123_v20  ;;  %v3652_v61 = vmov 1966171168   ;;  %v2597_v50 = vlaneseq }
 0x2cf   : > { %v3488_v62 = vpop.eup %3487  ;;  %v2298_v42 = vmul.f32 %v3486_v10, %v4859_v18  ;;  %3507 = vpow2.f32 %v2854_v55  ;;  %v4978_v41 = vunpack.c.l.s4 %v3652_v61  ;;  %v4980_v52 = vadd.f32 %v2479_v2, %v2478_v31 }
 0x2d0   : > { %v3490_v59 = vpop.eup %3489  ;;  %v2505_v6 = vrot.slane %v4959_v7, 1  ;;  %v2518_v39 = vrot.slane %v4965_v35, 1  ;;  %v2297_v30 = vmul.f32 %v3488_v62, %v4862_v53  ;;  %v4985_v38 = vadd.f32 %v2492_v33, %v2491_v0 }
 0x2d1   : > { %v3492_v34 = vpop.eup %3491  ;;  %v2408_v20 = vmul.f32 %v4738_v11, %v2296_v56  ;;  %v2299_v18 = vmul.f32 %v3490_v59, %v4866_v63  ;;  %v2856_v55 = vmul.f32 -1.442695, %v4971_v28  ;;  %v2410_v10 = vmul.f32 %v4738_v11, %v2298_v42 }
 0x2d2   : > { %v3494_v48 = vpop.eup %3493  ;;  %v2409_v31 = vmul.f32 %v4738_v11, %v2297_v30  ;;  %v2304_v2 = vmul.f32 %v3492_v34, %v4871_v22  ;;  %v4995_v61 = vadd.f32 %v4903_v44, %v4644_v51  ;;  %v5001_v63 = vadd.f32 %v4908_v15, %v4644_v51 }
 0x2d3   : > { %v3496_v53 = vpop.eup %3495  ;;  %v2411_v0 = vmul.f32 %v4738_v11, %v2299_v18  ;;  %v2306_v33 = vmul.f32 %v3494_v48, %v4875_v32  ;;  %3509 = vpow2.f32 %v2856_v55  ;;  %v5008_v22 = vadd.f32 %v4923_v43, %v4667_v54 }
 0x2d4   : > { %v3498_v56 = vpop.eup %3497  ;;  %v2416_v62 = vmul.f32 %v4746_v21, %v2304_v2  ;;  %v2305_v30 = vmul.f32 %v3496_v53, %v4878_v1  ;;  %v2855_v34 = vmul.f32 -1.442695, %v4995_v61  ;;  %v2857_v42 = vmul.f32 -1.442695, %v5001_v63 }
 0x2d5   : > { %v3500_v44 = vpop.eup %3499  ;;  %v2418_v11 = vmul.f32 %v4746_v21, %v2306_v33  ;;  %v2307_v32 = vmul.f32 %v3498_v56, %v4882_v58  ;;  %v5015_v51 = vadd.f32 %v4927_v57, %v4667_v54 }
 0x2d6   : > { %v3502_v15 = vpop.eup %3501  ;;  %v2520_v59 = vadd.f32 %v2416_v62, %v2408_v20  ;;  %v2417_v1 = vmul.f32 %v4746_v21, %v2305_v30  ;;  %v2312_v18 = vmul.f32 %v3500_v44, %v4888_v14  ;;  %3511 = vpow2.f32 %v2855_v34 }
 0x2d7   : > { %v3504_v43 = vpop.eup %3503  ;;  %v2546_v55 = vadd.f32 %v2418_v11, %v2410_v10  ;;  %v2419_v48 = vmul.f32 %v4746_v21, %v2307_v32  ;;  %v2314_v2 = vmul.f32 %v3502_v15, %v4891_v45  ;;  %3513 = vpow2.f32 %v2857_v42  ;;  %v5255_v11 = vld [vmem:[#allocation6_spill] sm:$0xff] }
 0x2d8   : > { %v3506_v58 = vpop.eup %3505  ;;  %v2533_v53 = vadd.f32 %v2417_v1, %v2409_v31  ;;  %v2424_v33 = vmul.f32 %v4759_v23, %v2312_v18  ;;  %v2313_v57 = vmul.f32 %v3504_v43, %v4894_v36  ;;  %v2862_v20 = vmul.f32 -1.442695, %v5008_v22 }
 0x2d9   : > { %v3508_v56 = vpop.eup %3507  ;;  %v2559_v62 = vadd.f32 %v2419_v48, %v2411_v0  ;;  %v2426_v14 = vmul.f32 %v4759_v23, %v2314_v2  ;;  %v2315_v30 = vmul.f32 %v3506_v58, %v4899_v17  ;;  %v2864_v10 = vmul.f32 -1.442695, %v5015_v51 }
 0x2da   : > { %v5027_v21 = vadd.f32 %v2520_v59, %v2424_v33  ;;  %v2425_v45 = vmul.f32 %v4759_v23, %v2313_v57  ;;  %v2128_v34 = vadd.f32 1.0, %v3508_v56  ;;  %3515 = vpow2.f32 %v2862_v20 }
 0x2db   : > { %v5030_v31 = vadd.f32 %v2546_v55, %v2426_v14  ;;  %v2427_v36 = vmul.f32 %v4759_v23, %v2315_v30  ;;  %3517 = vpow2.f32 %v2864_v10  ;;  %v5035_v0 = vadd.f32 %v4929_v8, %v4667_v54 }
 0x2dc   : > { %v5037_v44 = vadd.f32 %v2533_v53, %v2425_v45  ;;  %3519 = vrcp.f32 %v2128_v34  ;;  %v5041_v17 = vadd.f32 %v4936_v4, %v4667_v54  ;;  %v5045_v32 = vadd.f32 %v4938_v3, %v5255_v11 }
 0x2dd   : > { %v3510_v42 = vpop.eup %3509  ;;  %v5047_v15 = vadd.f32 %v2559_v62, %v2427_v36  ;;  %v2863_v23 = vmul.f32 -1.442695, %v5035_v0  ;;  %v5052_v8 = vadd.f32 %v4940_v46, %v5255_v11  ;;  %v2596_v59 = vunpack.c.0.s8 %v4978_v41 }
 0x2de   : > { %v2130_v1 = vadd.f32 1.0, %v3510_v42  ;;  %v2865_v18 = vmul.f32 -1.442695, %v5041_v17  ;;  %v2870_v54 = vmul.f32 -1.442695, %v5045_v32  ;;  %v5059_v4 = vadd.f32 %v4942_v60, %v5255_v11 }
 0x2df   : > { %v2506_v3 = vadd.f32 %v2505_v6, %v4959_v7  ;;  %v2519_v46 = vadd.f32 %v2518_v39, %v4965_v35  ;;  %3521 = vpow2.f32 %v2863_v23  ;;  %v2598_v41 = vshrl.u32 %v2597_v50, 7 }
 0x2e0   : > { %v3512_v43 = vpop.eup %3511  ;;  %v2574_v55 = vadd.f32 %v4974_v16, %v4980_v52  ;;  %v2575_v48 = vadd.f32 %v4974_v16, %v4985_v38  ;;  %3523 = vrcp.f32 %v2130_v1  ;;  %v5074_v60 = vadd.f32 %v4944_v29, %v5255_v11 }
 0x2e1   : > { %v3514_v7 = vpop.eup %3513  ;;  %v2129_v6 = vadd.f32 1.0, %v3512_v43  ;;  %3525 = vpow2.f32 %v2865_v18  ;;  %v2872_v39 = vmul.f32 -1.442695, %v5052_v8  ;;  %v5079_v35 = vadd.f32 %v4948_v9, %v4687_v49 }
 0x2e2   : > { %v2131_v50 = vadd.f32 1.0, %v3514_v7  ;;  %3527 = vpow2.f32 %v2870_v54  ;;  %v2871_v52 = vmul.f32 -1.442695, %v5059_v4  ;;  %v5084_v38 = vadd.f32 %v4950_v47, %v4687_v49 }
 0x2e3   : > { %v2576_v29 = vadd.f32 %v4974_v16, %v2506_v3  ;;  %v2577_v2 = vadd.f32 %v4974_v16, %v2519_v46  ;;  %3529 = vrcp.f32 %v2129_v6  ;;  %v5088_v58 = vsub.s32 %v2596_v59, %v2598_v41 }
 0x2e4   : > { %v3516_v53 = vpop.eup %3515  ;;  %3531 = vrcp.f32 %v2131_v50  ;;  %v5092_v9 = vadd.f32 %v4952_v26, %v4687_v49  ;;  %v2590_v33 = vcombine.low %v2574_v55, %v2575_v48  ;;  %v2873_v47 = vmul.f32 -1.442695, %v5074_v60 }
 0x2e5   : > { %v3518_v57 = vpop.eup %3517  ;;  %v2136_v20 = vadd.f32 1.0, %v3516_v53  ;;  %3533 = vpow2.f32 %v2872_v39  ;;  %v2878_v56 = vmul.f32 -1.442695, %v5079_v35  ;;  %v2880_v30 = vmul.f32 -1.442695, %v5084_v38 }
 0x2e6   : > { %v3520_v62 = vpop.eup %3519  ;;  %v2138_v14 = vadd.f32 1.0, %v3518_v57  ;;  %3535 = vpow2.f32 %v2871_v52  ;;  %v5099_v10 = vadd.f32 %v4955_v5, %v4687_v49  ;;  %v2591_v45 = vcombine.low %v2576_v29, %v2577_v2 }
 0x2e7   : > { %v2320_v26 = vmul.f32 %v3520_v62, %v4934_v25  ;;  %3537 = vrcp.f32 %v2136_v20  ;;  %v5103_v34 = vrot.slane %v2590_v33, %v5088_v58  ;;  %v2879_v36 = vmul.f32 -1.442695, %v5092_v9 }
 0x2e8   : > { %3539 = vrcp.f32 %v2138_v14  ;;  %v5109_v23 = vadd.f32 %v4957_v40, %v4715_v24  ;;  %v5112_v49 = vrot.slane %v2591_v45, %v5088_v58  ;;  %v2881_v59 = vmul.f32 -1.442695, %v5099_v10 }
 0x2e9   : > { %v3522_v11 = vpop.eup %3521  ;;  %v2432_v42 = vmul.f32 %v4769_v37, %v2320_v26  ;;  %3541 = vpow2.f32 %v2873_v47  ;;  %v5121_v41 = vadd.f32 %v4961_v27, %v4715_v24  ;;  %v5125_v43 = vadd.f32 %v4963_v13, %v4715_v24 }
 0x2ea   : > { %v3524_v25 = vpop.eup %3523  ;;  %v2137_v5 = vadd.f32 1.0, %v3522_v11  ;;  %3543 = vpow2.f32 %v2878_v56  ;;  %v2622_v3 = vcombine.low %v5103_v34, %v5112_v49  ;;  %v5134_v13 = vadd.f32 %v4967_v12, %v4715_v24 }
 0x2eb   : > { %v3526_v1 = vpop.eup %3525  ;;  %v2522_v18 = vadd.f32 %v5027_v21, %v2432_v42  ;;  %v2322_v54 = vmul.f32 %v3524_v25, %v4971_v28  ;;  %3545 = vpow2.f32 %v2880_v30  ;;  %v2886_v28 = vmul.f32 -1.442695, %v5109_v23 }
 0x2ec   : > { %v3528_v46 = vpop.eup %3527  ;;  %3547 = vrcp.f32 %v2137_v5  ;;  %v2139_v40 = vadd.f32 1.0, %v3526_v1  ;;  %v2888_v53 = vmul.f32 -1.442695, %v5121_v41 }
 0x2ed   : > { %v3530_v55 = vpop.eup %3529  ;;  %v2434_v21 = vmul.f32 %v4769_v37, %v2322_v54  ;;  %v2144_v48 = vadd.f32 1.0, %v3528_v46  ;;  %3549 = vpow2.f32 %v2879_v36 }
 0x2ee   : > { %v3532_v7 = vpop.eup %3531  ;;  %v2321_v6 = vmul.f32 %v3530_v55, %v4995_v61  ;;  %3551 = vrcp.f32 %v2139_v40 }
 0x2ef   : > { %v3534_v39 = vpop.eup %3533  ;;  %v2548_v50 = vadd.f32 %v5030_v31, %v2434_v21  ;;  %v2323_v27 = vmul.f32 %v3532_v7, %v5001_v63  ;;  %3553 = vrcp.f32 %v2144_v48  ;;  %v2887_v31 = vmul.f32 -1.442695, %v5125_v43 }
 0x2f0   : > { %v3536_v52 = vpop.eup %3535  ;;  %v2433_v29 = vmul.f32 %v4769_v37, %v2321_v6  ;;  %v2146_v2 = vadd.f32 1.0, %v3534_v39  ;;  %3555 = vpow2.f32 %v2881_v59 }
 0x2f1   : > { %v3538_v33 = vpop.eup %3537  ;;  %v2435_v61 = vmul.f32 %v4769_v37, %v2323_v27  ;;  %v2145_v57 = vadd.f32 1.0, %v3536_v52  ;;  %3557 = vpow2.f32 %v2886_v28  ;;  %v5256_v28 = vld [vmem:[#allocation7_spill] sm:$0xff] }
 0x2f2   : > { %v3540_v63 = vpop.eup %3539  ;;  %v2535_v20 = vadd.f32 %v5037_v44, %v2433_v29  ;;  %v2328_v24 = vmul.f32 %v3538_v33, %v5008_v22  ;;  %3559 = vrcp.f32 %v2146_v2  ;;  %v2889_v44 = vmul.f32 -1.442695, %v5134_v13 }
 0x2f3   : > { %v3542_v12 = vpop.eup %3541  ;;  %v2561_v47 = vadd.f32 %v5047_v15, %v2435_v61  ;;  %v2330_v56 = vmul.f32 %v3540_v63, %v5015_v51  ;;  %3561 = vrcp.f32 %v2145_v57 }
 0x2f4   : > { %v3544_v62 = vpop.eup %3543  ;;  %v2440_v14 = vmul.f32 %v4817_v19, %v2328_v24  ;;  %v2147_v37 = vadd.f32 1.0, %v3542_v12  ;;  %3563 = vpow2.f32 %v2888_v53 }
 0x2f5   : > { %v3546_v30 = vpop.eup %3545  ;;  %v2442_v26 = vmul.f32 %v4817_v19, %v2330_v56  ;;  %v2152_v45 = vadd.f32 1.0, %v3544_v62  ;;  %3565 = vpow2.f32 %v2887_v31  ;;  %v5257_v62 = vld [vmem:[#allocation8_spill] sm:$0xff] }
 0x2f6   : > { %v3548_v22 = vpop.eup %3547  ;;  %v2523_v36 = vadd.f32 %v2522_v18, %v2440_v14  ;;  %3567 = vrcp.f32 %v2147_v37  ;;  %v2154_v11 = vadd.f32 1.0, %v3546_v30 }
 0x2f7   : > { %v3550_v15 = vpop.eup %3549  ;;  %v2549_v42 = vadd.f32 %v2548_v50, %v2442_v26  ;;  %v2329_v51 = vmul.f32 %v3548_v22, %v5035_v0  ;;  %3569 = vrcp.f32 %v2152_v45 }
 0x2f8   : > { %v3552_v25 = vpop.eup %3551  ;;  %3571 = vrcp.f32 %v2154_v11  ;;  %v2153_v5 = vadd.f32 1.0, %v3550_v15 }
 0x2f9   : > { %v3554_v59 = vpop.eup %3553  ;;  %v2441_v1 = vmul.f32 %v4817_v19, %v2329_v51  ;;  %v2331_v54 = vmul.f32 %v3552_v25, %v5041_v17  ;;  %3573 = vpow2.f32 %v2889_v44  ;;  %v5258_v25 = vld [vmem:[#allocation9_spill] sm:$0xff] }
 0x2fa   : > { %v3556_v46 = vpop.eup %3555  ;;  %v2336_v40 = vmul.f32 %v3554_v59, %v5045_v32  ;;  %3575 = vrcp.f32 %v2153_v5 }
 0x2fb   : > { %v3558_v18 = vpop.eup %3557  ;;  %v2536_v55 = vadd.f32 %v2535_v20, %v2441_v1  ;;  %v2443_v21 = vmul.f32 %v4817_v19, %v2331_v54  ;;  %v2155_v48 = vadd.f32 1.0, %v3556_v46 }
 0x2fc   : > { %v3560_v0 = vpop.eup %3559  ;;  %v2448_v7 = vmul.f32 %v5256_v28, %v2336_v40  ;;  %v2160_v6 = vadd.f32 1.0, %v3558_v18 }
 0x2fd   : > { %v3562_v39 = vpop.eup %3561  ;;  %v2562_v50 = vadd.f32 %v2561_v47, %v2443_v21  ;;  %v2338_v27 = vmul.f32 %v3560_v0, %v5052_v8  ;;  %3577 = vrcp.f32 %v2155_v48 }
 0x2fe   : > { %v3564_v17 = vpop.eup %3563  ;;  %v2524_v52 = vadd.f32 %v2523_v36, %v2448_v7  ;;  %v2337_v29 = vmul.f32 %v3562_v39, %v5059_v4  ;;  %3579 = vrcp.f32 %v2160_v6 }
 0x2ff   : > { %v3566_v32 = vpop.eup %3565  ;;  %v2450_v2 = vmul.f32 %v5256_v28, %v2338_v27  ;;  %v2162_v53 = vadd.f32 1.0, %v3564_v17 }
 0x300   : > { %v3568_v19 = vpop.eup %3567  ;;  %v2449_v33 = vmul.f32 %v5256_v28, %v2337_v29  ;;  %v2161_v61 = vadd.f32 1.0, %v3566_v32 }
 0x301   : > { %v3570_v57 = vpop.eup %3569  ;;  %v2550_v31 = vadd.f32 %v2549_v42, %v2450_v2  ;;  %v2339_v63 = vmul.f32 %v3568_v19, %v5074_v60  ;;  %3581 = vrcp.f32 %v2162_v53 }
 0x302   : > { %v3572_v8 = vpop.eup %3571  ;;  %v2537_v20 = vadd.f32 %v2536_v55, %v2449_v33  ;;  %v2344_v24 = vmul.f32 %v3570_v57, %v5079_v35  ;;  %3583 = vrcp.f32 %v2161_v61 }
 0x303   : > { %v3574_v4 = vpop.eup %3573  ;;  %v2451_v12 = vmul.f32 %v5256_v28, %v2339_v63  ;;  %v2346_v47 = vmul.f32 %v3572_v8, %v5084_v38 }
 0x304   : > { %v3576_v56 = vpop.eup %3575  ;;  %v2456_v14 = vmul.f32 %v5257_v62, %v2344_v24  ;;  %v2163_v37 = vadd.f32 1.0, %v3574_v4 }
 0x305   : > { %v2563_v30 = vadd.f32 %v2562_v50, %v2451_v12  ;;  %v2458_v26 = vmul.f32 %v5257_v62, %v2346_v47  ;;  %v2345_v60 = vmul.f32 %v3576_v56, %v5092_v9 }
 0x306   : > { %v2525_v45 = vadd.f32 %v2524_v52, %v2456_v14  ;;  %3585 = vrcp.f32 %v2163_v37 }
 0x307   : > { %v3578_v44 = vpop.eup %3577  ;;  %v2551_v22 = vadd.f32 %v2550_v31, %v2458_v26  ;;  %v2457_v35 = vmul.f32 %v5257_v62, %v2345_v60  ;;  %v2630_v60 = vrot.slane %v2622_v3, %v5088_v58 }
 0x308   : > { %v3580_v36 = vpop.eup %3579  ;;  %v2347_v11 = vmul.f32 %v3578_v44, %v5099_v10 }
 0x309   : > { %v2538_v15 = vadd.f32 %v2537_v20, %v2457_v35  ;;  %v2352_v38 = vmul.f32 %v3580_v36, %v5109_v23 }
 0x30a   : > { %v2459_v42 = vmul.f32 %v5257_v62, %v2347_v11 }
 0x30b   : > { %v3582_v51 = vpop.eup %3581  ;;  %v2464_v5 = vmul.f32 %v5258_v25, %v2352_v38 }
 0x30c   : > { %v3584_v59 = vpop.eup %3583  ;;  %v2564_v1 = vadd.f32 %v2563_v30, %v2459_v42  ;;  %v2354_v9 = vmul.f32 %v3582_v51, %v5121_v41 }
 0x30d   : > { %v2526_v54 = vadd.f32 %v2525_v45, %v2464_v5  ;;  %v2353_v46 = vmul.f32 %v3584_v59, %v5125_v43 }
 0x30e   : > { %v2466_v40 = vmul.f32 %v5258_v25, %v2354_v9 }
 0x30f   : > { %v2527_v18 = vrot.slane %v2526_v54, 4  ;;  %v2465_v10 = vmul.f32 %v5258_v25, %v2353_v46 }
 0x310   : > { %v3586_v55 = vpop.eup %3585  ;;  %v2552_v21 = vadd.f32 %v2551_v22, %v2466_v40 }
 0x311   : > { %v2528_v23 = vadd.f32 %v2527_v18, %v2526_v54  ;;  %v2539_v48 = vadd.f32 %v2538_v15, %v2465_v10  ;;  %v2355_v0 = vmul.f32 %v3586_v55, %v5134_v13 }
 0x312   : > { %v2553_v28 = vrot.slane %v2552_v21, 4 }
 0x313   : > { %v2529_v7 = vrot.slane %v2528_v23, 2  ;;  %v2540_v6 = vrot.slane %v2539_v48, 4  ;;  %v2467_v39 = vmul.f32 %v5258_v25, %v2355_v0 }
 0x314   : > { %v2554_v41 = vadd.f32 %v2553_v28, %v2552_v21 }
 0x315   : > { %v2530_v50 = vadd.f32 %v2529_v7, %v2528_v23  ;;  %v2541_v27 = vadd.f32 %v2540_v6, %v2539_v48  ;;  %v2565_v43 = vadd.f32 %v2564_v1, %v2467_v39 }
 0x316   : > { %v2555_v17 = vrot.slane %v2554_v41, 2 }
 0x317   : > { %v2531_v52 = vrot.slane %v2530_v50, 1  ;;  %v2542_v29 = vrot.slane %v2541_v27, 2  ;;  %v2566_v32 = vrot.slane %v2565_v43, 4 }
 0x318   : > { %v2556_v2 = vadd.f32 %v2555_v17, %v2554_v41 }
 0x319   : > { %v2532_v53 = vadd.f32 %v2531_v52, %v2530_v50  ;;  %v2543_v19 = vadd.f32 %v2542_v29, %v2541_v27  ;;  %v2567_v33 = vadd.f32 %v2566_v32, %v2565_v43 }
 0x31a   : > { %v2557_v61 = vrot.slane %v2556_v2, 1 }
 0x31b   : > { %v2544_v13 = vrot.slane %v2543_v19, 1  ;;  %v2568_v57 = vrot.slane %v2567_v33, 2  ;;  %v2578_v31 = vadd.f32 %v4974_v16, %v2532_v53 }
 0x31c   : > { %v2558_v63 = vadd.f32 %v2557_v61, %v2556_v2 }
 0x31d   : > { %v2545_v8 = vadd.f32 %v2544_v13, %v2543_v19  ;;  %v2569_v20 = vadd.f32 %v2568_v57, %v2567_v33 }
 0x31e   : > { %v2580_v12 = vadd.f32 %v4974_v16, %v2558_v63 }
 0x31f   : > { %v2579_v24 = vadd.f32 %v4974_v16, %v2545_v8  ;;  %v2570_v4 = vrot.slane %v2569_v20, 1 }
 0x321   : > { %v2571_v47 = vadd.f32 %v2570_v4, %v2569_v20  ;;  %v2592_v56 = vcombine.low %v2578_v31, %v2579_v24 }
 0x323   : > { %v2581_v62 = vadd.f32 %v4974_v16, %v2571_v47  ;;  %v2614_v37 = vrot.slane %v2592_v56, %v5088_v58 }
 0x325   : > { %v2593_v14 = vcombine.low %v2580_v12, %v2581_v62 }
 0x327   : > { %v2621_v30 = vrot.slane %v2593_v14, %v5088_v58 }
 0x329   : > { %v2623_v26 = vcombine.low %v2614_v37, %v2621_v30 }
 0x32b   : > { %v2637_v45 = vrot.slane %v2623_v26, %v5088_v58 }
 0x32d   : > { %v2638_v44 = vcombine.low %v2630_v60, %v2637_v45 }
 0x32f   : > { %2640 = vst [vmem:[%s273_s15] sm:$0xff] %v2638_v44 }
 0x330   : > { %3600 = shalt.err (!%p3597_p3)
}
 0x331   : > { %s3601_s14 = scalar_lea.hbm %s5191_s21, 128  ;;  %s3605_s30 = scalar_lea.hbm %s5240_s7, 256 }
 0x332   : > { %p3602_p4 = scmp.ne.s32.totalorder %s5191_s21, %s3601_s14  ;;  %p3606_p9 = scmp.lt.u32.totalorder %s5191_s21, %s5240_s7 }
 0x333   : > { %p3607_p10 = scmp.lt.u32.totalorder %s3605_s30, %s3601_s14  ;;  %p3609_p12 = scmp.lt.u32.totalorder %s3601_s14, %s5191_s21 }
 0x334   : > { %p3603_p7 = pnand %p3602_p4, %p3732_p5 }
 0x335   : > { %p3608_p11 = por %p3607_p10, %p3606_p9 }
 0x336   : > { %p3604_p8 = pneg %p3603_p7 }
 0x337   : > { %p3610_p13 = por %p3609_p12, %p3608_p11 }
 0x339   : > { %p3611_p0 = pnand %p3610_p13, %p3604_p8 }
 0x33b   : > { %3614 = shalt.err (!%p3611_p0)
}
 0x33c   : > { %3024 = dma.vmem_to_hbm [thread:$0]  (%p3732_p5), %s5193_s16, 128, %s5191_s21, %s2642_s19  }
 0x33d PF: > { %p3030_p1 = scmp.ge.s32.totalorder %s3649_s29, 2  ;;  %s2668_s15 = sand.u32 1, %s3637_s26  }
 0x33e   : > { %s2669_s17 = scalar_lea.sflag [#allocation4], %s2668_s15 }
 0x33f   : > { %p3027_p2 = pnand %p3030_p1, %p3736_p6 }
 0x341   : > { %3632 = dma.done.wait (!%p3027_p2), %s2669_s17, 128  }
 0x342   : > { %3634 = vsyncadd (!%p3027_p2), %s2669_s17, 4294967168  ;;  %p18_p3 = scmp.ge.s32.totalorder %s3720_s8, 4   ;;  %s5259_s26 = smov %s3641_s27 }
 0x343   : > { %s5260_s27 = smov %s3645_s28  ;;  %s5261_s28 = smov %s3730_s11 }
 0x344   : > { %s5262_s29 = smov %s3720_s8  ;;  %20 = sbr.rel (!%p18_p3) target bundleno = 5 (0x5), region = 83 }
 0x34b   :  { %2674 = vsyncpa [#allocation4], 1 }
 0x34c   :  { %2676 = vsyncpa [#allocation4 + $0x1], 1 }

</bundles_post_ra>
